<compile_context>
chip_gen: v7x
topology: tpu7x:2x2x1
jax: 0.10.0
libtpu: 0.0.40
codegen_flags: <defaults>
</compile_context>

<pallas_src>
import jax
import jax.numpy as jnp
from jax.experimental import pallas as pl
from jax.experimental.pallas import tpu as pltpu

_EPS = 1e-12  # F.normalize default eps
_SMALL_TENSOR_BYTES = 512 << 10  # below this, XLA fusion beats pallas_call


def _l2_normalize_kernel(x_ref, out_ref):
    # Row-wise L2 normalize the whole VMEM tile.
    x = x_ref[...].astype(jnp.float32)
    sq_sum = jnp.sum(x * x, axis=-1, keepdims=True)
    # 1/max(||x||, eps) == rsqrt(max(||x||^2, eps^2)); zero rows stay zero.
    inv = jax.lax.rsqrt(jnp.maximum(sq_sum, _EPS * _EPS))
    out_ref[...] = (x * inv).astype(out_ref.dtype)


def _l2_normalize_ref(x: jax.Array) -> jax.Array:
    # Plain-JAX reference / fallback path (matches torch F.normalize).
    sq_sum = jnp.sum(x.astype(jnp.float32) ** 2, axis=-1, keepdims=True)
    inv = jax.lax.rsqrt(jnp.maximum(sq_sum, _EPS * _EPS))
    return (x.astype(jnp.float32) * inv).astype(x.dtype)


def _sublane_multiple(dtype) -> int:
    """Row-alignment so packed vregs are full: 8 f32, 16 bf16/f16, 32 int8/fp8."""
    itemsize = jnp.dtype(dtype).itemsize
    if itemsize >= 4:
        return 8
    if itemsize == 2:
        return 16
    return 32


def _vmem_capacity_bytes() -> int:
    """Physical VMEM per core; conservative v7x default if the query fails."""
    try:
        info = pltpu.get_tpu_info()
        cap = getattr(info, "vmem_capacity_bytes", None)
        if cap:
            return int(cap)
    except Exception:
        pass
    return 64 << 20


def _pick_tiling(B: int, E: int, dtype, vmem_cap: int):
    """Choose (block_rows, vmem_limit_bytes), or (None, None) to fall back.

    Per-tile VMEM accounts for double-buffered input + output in the I/O dtype
    plus f32 working copies only when an up-cast is actually required.
    """
    itemsize = jnp.dtype(dtype).itemsize
    sub = _sublane_multiple(dtype)
    in_row_bytes = E * itemsize
    per_row_bytes = 4 * in_row_bytes + (0 if itemsize == 4 else 2 * E * 4)

    # Fatter per-step DMA on v7x (64 MiB VMEM, ~3.2 TB/s) where per-step
    # overhead is relatively more expensive; 4 MiB is plenty on v5e/v6e.
    target_step_bytes = (8 << 20) if vmem_cap <= (64 << 20) else (4 << 20)
    tile_budget = min(44 << 20, max(12 << 20, (vmem_cap * 2) // 3))

    rows_budget = max(1, tile_budget // per_row_bytes)
    rows_target = max(1, target_step_bytes // max(1, in_row_bytes))
    br = min(rows_budget, rows_target, B)

    # Keep >= ~4 grid steps when B allows: preserves pipelining and lets
    # ("parallel",) spread work across both v7x TensorCores.
    if B >= 4 * sub:
        br = min(br, max(sub, ((B // 4) // sub) * sub))

    if B >= sub:
        br = max(sub, (br // sub) * sub)  # sublane-aligned minimum tile
    else:
        br = B  # full-extent block is always legal

    needed = per_row_bytes * br + (2 << 20)  # tile buffers + small slack
    ceiling = vmem_cap - (8 << 20)           # never park right at physical VMEM
    if needed > ceiling:
        # Even the minimum tile would not fit safely (extremely wide E).
        # TODO(synk): two-pass tiled-E reduction path for E in the ~100K+ range.
        return None, None
    vmem_limit = int(min(ceiling, max(32 << 20, needed)))
    return br, vmem_limit


def head_xbm_forward(x: jax.Array):
    """Pallas implementation of HeadXBM.forward.

    Args:
      x: (batch, emb) array.

    Returns:
      (normalized, normalized) — the same L2-normalized array returned twice,
      matching `return (F.normalize(x), F.normalize(x))`.
    """
    B, E = x.shape
    itemsize = jnp.dtype(x.dtype).itemsize

    # Fallbacks: lane-sparse embeddings waste 3/4+ of each vreg on masked
    # stores, and tiny tensors are dominated by pallas_call launch overhead.
    if E < 128 or B * E * itemsize < _SMALL_TENSOR_BYTES:
        y = _l2_normalize_ref(x)
        return y, y

    vmem_cap = _vmem_capacity_bytes()
    block_rows, vmem_limit = _pick_tiling(B, E, x.dtype, vmem_cap)
    if block_rows is None:
        y = _l2_normalize_ref(x)
        return y, y

    grid = (pl.cdiv(B, block_rows),)
    # Reduction (emb) axis stays whole inside one tile; rows tiled on the grid.
    spec = pl.BlockSpec((block_rows, E), lambda i: (i, 0))

    cost = pl.CostEstimate(
        flops=3 * B * E,            # square, accumulate, scale
        transcendentals=B,          # one rsqrt per row
        bytes_accessed=2 * B * E * itemsize,
    )

    y = pl.pallas_call(
        _l2_normalize_kernel,
        out_shape=jax.ShapeDtypeStruct((B, E), x.dtype),
        grid=grid,
        in_specs=[spec],
        out_specs=spec,
        compiler_params=pltpu.CompilerParams(
            dimension_semantics=("parallel",),
            vmem_limit_bytes=vmem_limit,
        ),
        cost_estimate=cost,
    )(x)
    # Duplicate is free at the JAX level (same buffer aliased twice).
    return y, y


if __name__ == "__main__":
    key = jax.random.PRNGKey(0)

    def _check(xv):
        y1, y2 = head_xbm_forward(xv)
        jax.block_until_ready(y1)
        jax.block_until_ready(y2)
        ref = xv / jnp.maximum(
            jnp.sqrt(jnp.sum(xv * xv, axis=-1, keepdims=True)), _EPS
        )
        assert jnp.allclose(y1, ref, atol=1e-5, rtol=1e-5), "output 1 mismatch"
        assert jnp.allclose(y2, ref, atol=1e-5, rtol=1e-5), "output 2 mismatch"

    # Tiny shape (exercises the plain-JAX fallback path).
    k1, k2 = jax.random.split(key)
    _check(jax.random.normal(k1, (64, 128), dtype=jnp.float32))

    # Moderate shape (exercises the Pallas streaming path: 2 MiB, grid of ~4).
    _check(jax.random.normal(k2, (2048, 256), dtype=jnp.float32))

    print("KERNEL_OK")
</pallas_src>

<mosaic_0001>
module attributes {stable_mosaic.version = 11 : i64} {
  func.func @_l2_normalize_kernel(%arg0: i32, %arg1: memref<512x256xf32, #tpu.memory_space<vmem>>, %arg2: memref<512x256xf32, #tpu.memory_space<vmem>>) attributes {dimension_semantics = [#tpu.dimension_semantics<parallel>], iteration_bounds = array<i64: 4>, scalar_prefetch = 0 : i64, scratch_operands = 0 : i64, tpu.core_type = #tpu.core_type<tc>, window_params = [{transform_indices = @transform_0, window_bounds = array<i64: 512, 256>}, {transform_indices = @transform_1, window_bounds = array<i64: 512, 256>}]} {
    %c0 = arith.constant 0 : index
    %c0_0 = arith.constant 0 : index
    %0 = vector.load %arg1[%c0, %c0_0] : memref<512x256xf32, #tpu.memory_space<vmem>>, vector<512x256xf32>
    %1 = arith.mulf %0, %0 : vector<512x256xf32>
    %cst = arith.constant dense<0.000000e+00> : vector<512xf32>
    %2 = vector.multi_reduction <add>, %1, %cst [1] : vector<512x256xf32> to vector<512xf32>
    %3 = vector.shape_cast %2 : vector<512xf32> to vector<512x1xf32>
    %cst_1 = arith.constant 1.000000e-24 : f32
    %4 = vector.broadcast %cst_1 : f32 to vector<512x1xf32>
    %5 = arith.maximumf %3, %4 : vector<512x1xf32>
    %6 = math.rsqrt %5 : vector<512x1xf32>
    %7 = vector.broadcast %6 : vector<512x1xf32> to vector<512x256xf32>
    %8 = arith.mulf %0, %7 : vector<512x256xf32>
    %c0_2 = arith.constant 0 : index
    %c0_3 = arith.constant 0 : index
    %9 = vector.load %arg2[%c0_2, %c0_3] : memref<512x256xf32, #tpu.memory_space<vmem>>, vector<512x256xf32>
    tpu.vector_store %arg2[%c0_2, %c0_3], %8 {strides = array<i32>} : memref<512x256xf32, #tpu.memory_space<vmem>>, vector<512x256xf32>,
    return
  }
  func.func @transform_0(%arg0: i32) -> (i32, i32) {
    %c0_i32 = arith.constant 0 : i32
    %c0_i32_0 = arith.constant 0 : i32
    return %arg0, %c0_i32 : i32, i32
  }
  func.func @transform_1(%arg0: i32) -> (i32, i32) {
    %c0_i32 = arith.constant 0 : i32
    %c0_i32_0 = arith.constant 0 : i32
    return %arg0, %c0_i32 : i32, i32
  }
}

</mosaic_0001>

<bundles_post_ra>
// kernel: tpu_custom_call.1
= control target key start
LH: loop header
LB: loop body
LE: loop exit
PB: predicated region body
PF: predicated region fallthrough
CT: control target
= control target key end

     0   :  { %6 = vsyncpa [#allocation3], 0  ;;  %s2351_s0 = inlined_call_operand.hbm [shape: f32[2048,256], index: 0, kind: input, shape index: {}]   ;;  %s2352_s1 = inlined_call_operand.hbm [shape: f32[2048,256], index: 1, kind: output, shape index: {}]  }
   0x1   :  { %8 = vsyncpa [#allocation3 + $0x1], 0 }
   0x2   :  { %9 = vsyncpa [#allocation4], 0 }
   0x3   :  { %11 = vsyncpa [#allocation4 + $0x1], 0  ;;  %s1398_s6 = smov 0   ;;  %s1400_s7 = smov 0  }
   0x4   :  { %s1402_s8 = smov 0   ;;  %s1404_s9 = smov 0  }
   0x5 LB: > { %s1419_s10 = sadd.s32 4294967295, %s1380_s9   ;;  %s1058_s11 = sadd.s32 4294967294, %s1380_s9   ;;  %s1380_s9 = sphi %s1404_s9, %s2550_s9   ;;  %s1376_s8 = sphi %s1402_s8, %s2549_s8   ;;  %s1372_s7 = sphi %s1400_s7, %s2548_s7   ;;  %s1368_s6 = sphi %s1398_s6, %s2547_s6  }
   0x6   : > { %s1423_s12 = sadd.s32 1, %s1380_s9   ;;  %s24_s13 = sadd.s32 1, %s1376_s8 }
   0x7   : > { %s21_s14 = ssub.s32 %s1380_s9, %s1423_s12  ;;  %p31_p0 = scmp.ne.s32.totalorder %s1376_s8, %s1372_s7 }
   0x8   : > { %p22_p1 = scmp.eq.s32.totalorder %s21_s14, 0  ;;  %p32_p2 = scmp.eq.s32.totalorder %s1380_s9, 0 }
   0x9   : > { %p37_p3 = scmp.ne.s32.totalorder %s1372_s7, %s1368_s6  ;;  %p38_p4 = scmp.eq.s32.totalorder %s1419_s10, 0 }
   0xa   : > { %s1435_s15 = scalar_select %p22_p1, %s1376_s8, %s24_s13  }
   0xb   : > { %p1437_p5 = por %p32_p2, %p31_p0  ;;  %p1441_p6 = por %p38_p4, %p37_p3 }
   0xc   : > { %p61_p7 = scmp.eq.s32.totalorder %s1419_s10, 3  ;;  %p67_p8 = scmp.eq.s32.totalorder %s1058_s11, 3 }
   0xd   : > { %p1090_p9 = scmp.lt.s32.totalorder %s1380_s9, 4  ;;  %s87_s20 = sand.u32 1, %s1376_s8  }
   0xe   : > { %p1447_p10 = por %p61_p7, %p31_p0  ;;  %p1451_p11 = por %p67_p8, %p37_p3 }
   0xf   : > { %s1075_s21 = sshll.u32 %s1380_s9, 14  ;;  %s1061_s22 = sshll.u32 %s87_s20, 10 }
  0x10   : > { %s2418_s18 = scalar_select %p1447_p10, 1, 0 }
  0x11   : > { %s2419_s19 = scalar_select %p1451_p11, 1, 0 }
  0x12   : > { %s1460_s25 = scalar_lea.hbm %s2351_s0, %s1075_s21  ;;  %s91_s26 = scalar_lea.vmem [#allocation2], %s1061_s22 }
  0x13   : > { %s99_s27 = sshll.u32 %s91_s26, 4  ;;  %p1464_p12 = pnand %p1090_p9, %p1437_p5  ;;  %s1468_s27 = int_to_ptr.vmem [resolvable:$true] %s99_s27 }
  0x14   : > { %s1470_s29 = scalar_lea.sflag [#allocation3], %s87_s20  ;;  %s1284_s30 = scalar_lea.hbm %s1460_s25, 16384 }
  0x15   : > { %p1285_p13 = scmp.ne.s32.totalorder %s1460_s25, %s1284_s30  ;;  %p1286_p0 = pneg %p1464_p12 }
  0x16   : > { %s1289_s4 = scalar_lea.hbm %s2351_s0, 65536  ;;  %p1290_p3 = scmp.lt.u32.totalorder %s1460_s25, %s2351_s0 }
  0x17   : > { %p1287_p1 = pnand %p1286_p0, %p1285_p13  ;;  %p1291_p4 = scmp.lt.u32.totalorder %s1289_s4, %s1284_s30 }
  0x18   : > { %p1293_p7 = scmp.lt.u32.totalorder %s1284_s30, %s1460_s25 }
  0x19   : > { %p1288_p2 = pneg %p1287_p1  ;;  %p1292_p5 = por %p1291_p4, %p1290_p3 }
  0x1b   : > { %p1294_p8 = por %p1293_p7, %p1292_p5 }
  0x1d   : > { %p1295_p9 = pnand %p1294_p8, %p1288_p2 }
  0x1f   : > { %1298 = shalt.err (!%p1295_p9)
}
  0x20   : > { %s1299_s13 = scalar_lea.vmem %s1468_s27, 16384  ;;  %s1382_s14 = smov [#allocation2]  }
  0x21   : > { %p1300_p13 = scmp.ne.s32.totalorder %s1468_s27, %s1299_s13  ;;  %s1304_s16 = sshll.u32 %s1382_s14, 4  ;;  %s1305_s16 = int_to_ptr.vmem [resolvable:$false] %s1304_s16 }
  0x22   : > { %s1306_s20 = scalar_lea.vmem %s1305_s16, 32768  ;;  %p1307_p10 = scmp.lt.s32.totalorder %s1468_s27, %s1305_s16 }
  0x23   : > { %p1302_p1 = pnand %p1300_p13, %p1286_p0  ;;  %p1308_p3 = scmp.lt.s32.totalorder %s1306_s20, %s1299_s13 }
  0x25   : > { %p1303_p11 = pneg %p1302_p1  ;;  %p1309_p4 = por %p1308_p3, %p1307_p10 }
  0x27   : > { %p1310_p5 = pnand %p1309_p4, %p1303_p11 }
  0x29   : > { %1313 = shalt.err (!%p1310_p5)
}
  0x2a   : > { %s1383_s21 = smov 256   ;;  %s1384_s22 = smov 16  }
  0x2b   : > { %1085 = dma.hbm_to_vmem [thread:$0]  (!%p1464_p12), %s1460_s25, 16384, %s1468_s27, %s1470_s29, %s1383_s21, %s1383_s21, %s1384_s22  }
  0x2c   : > { %p1065_p0 = scmp.ge.s32.totalorder %s1380_s9, 1  ;;  %p107_p2 = scmp.lt.s32.totalorder %s1380_s9, 5 }
  0x2e   : > { %p108_p7 = pnand %p1065_p0, %p107_p2 }
  0x30   : > { %111 = sbr.rel (%p108_p7) target bundleno = 361 (0x169), region = 24 }
  0x37   : > { %s1501_s23 = sand.u32 1, %s1372_s7  }
  0x38   : > { %s1066_s24 = sshll.u32 %s1501_s23, 10  ;;  %s114_s26 = scalar_lea.sflag [#allocation3], %s1501_s23 }
  0x39   : > { %s1507_s30 = scalar_lea.vmem [#allocation2], %s1066_s24 }
  0x3a   : > { %1359 = dma.done.wait (%p1441_p6), %s114_s26, 16384  }
  0x3b   : > { %1361 = vsyncadd (%p1441_p6), %s114_s26, 4294950912  ;;  %v1514_v0 = vld [vmem:[%s1507_s30 + $0x20] sm:$0xff]  ;;  %v1517_v1 = vld [vmem:[%s1507_s30 + $0x28] sm:$0xff]  ;;  %s2047_s17 = scalar_lea.vmem [#allocation5], %s1066_s24  ;;  %s1077_s25 = sshll.u32 %s1419_s10, 14 }
  0x3c   : > { %v1520_v2 = vld [vmem:[%s1507_s30] sm:$0xff]  ;;  %v270_v3 = vmul.f32 %v1514_v0, %v1514_v0  ;;  %v271_v4 = vmul.f32 %v1517_v1, %v1517_v1  ;;  %v1527_v5 = vld [vmem:[%s1507_s30 + $0x8] sm:$0xff]  ;;  %v1532_v7 = vld [vmem:[%s1507_s30 + $0x30] sm:$0xff]  ;;  %s985_s27 = sshll.u32 %s2047_s17, 4  ;;  %s2300_s29 = scalar_lea.hbm %s2352_s1, %s1077_s25  ;;  %s2302_s27 = int_to_ptr.vmem [resolvable:$true] %s985_s27 }
  0x3d   : > { %v266_v6 = vmul.f32 %v1520_v2, %v1520_v2  ;;  %v1535_v8 = vld [vmem:[%s1507_s30 + $0x38] sm:$0xff]  ;;  %v267_v9 = vmul.f32 %v1527_v5, %v1527_v5  ;;  %v272_v10 = vmul.f32 %v1532_v7, %v1532_v7  ;;  %v1544_v12 = vld [vmem:[%s1507_s30 + $0x10] sm:$0xff]  ;;  %v1560_v19 = vld [vmem:[%s1507_s30 + $0x40] sm:$0xff]  ;;  %s971_s2 = scalar_lea.sflag [#allocation4], %s1501_s23  ;;  %s1314_s3 = scalar_lea.vmem %s2302_s27, 16384 }
  0x3e   : > { %v273_v11 = vmul.f32 %v1535_v8, %v1535_v8  ;;  %v1547_v13 = vld [vmem:[%s1507_s30 + $0x18] sm:$0xff]  ;;  %v1550_v14 = vld [vmem:[%s1507_s30 + $0x50] sm:$0xff]  ;;  %v400_v15 = vadd.f32 %v271_v4, %v270_v3  ;;  %v268_v16 = vmul.f32 %v1544_v12, %v1544_v12  ;;  %v1563_v20 = vld [vmem:[%s1507_s30 + $0x48] sm:$0xff]  ;;  %v274_v26 = vmul.f32 %v1560_v19, %v1560_v19  ;;  %p1315_p6 = scmp.ne.s32.totalorder %s2302_s27, %s1314_s3  ;;  %p2545_p10 = scmp.ne.s32.totalorder %s2418_s18, 0 }
  0x3f   : > { %v269_v17 = vmul.f32 %v1547_v13, %v1547_v13  ;;  %v1557_v18 = vld [vmem:[%s1507_s30 + $0x58] sm:$0xff]  ;;  %v394_v21 = vadd.f32 %v267_v9, %v266_v6  ;;  %v276_v23 = vmul.f32 %v1550_v14, %v1550_v14  ;;  %v275_v27 = vmul.f32 %v1563_v20, %v1563_v20  ;;  %v1574_v28 = vld [vmem:[%s1507_s30 + $0x70] sm:$0xff]  ;;  %v1580_v30 = vld [vmem:[%s1507_s30 + $0x60] sm:$0xff]  ;;  %s1385_s4 = smov [#allocation5]  }
  0x40   : > { %401 = vadd.xlane.f32.xlu1 %v400_v15  ;;  %v403_v22 = vadd.f32 %v273_v11, %v272_v10  ;;  %v277_v24 = vmul.f32 %v1557_v18, %v1557_v18  ;;  %v1577_v29 = vld [vmem:[%s1507_s30 + $0x78] sm:$0xff]  ;;  %v1583_v31 = vld [vmem:[%s1507_s30 + $0x68] sm:$0xff]  ;;  %v280_v33 = vmul.f32 %v1574_v28, %v1574_v28  ;;  %v278_v36 = vmul.f32 %v1580_v30, %v1580_v30  ;;  %v1594_v38 = vld [vmem:[%s1507_s30 + $0x90] sm:$0xff]  ;;  %p1316_p11 = pnand %p1315_p6, %p2545_p10  ;;  %s1318_s5 = sshll.u32 %s1385_s4, 4  ;;  %s1319_s5 = int_to_ptr.vmem [resolvable:$false] %s1318_s5 }
  0x41   : > { %395 = vadd.xlane.f32.xlu0 %v394_v21  ;;  %v397_v25 = vadd.f32 %v269_v17, %v268_v16  ;;  %v281_v34 = vmul.f32 %v1577_v29, %v1577_v29  ;;  %v406_v35 = vadd.f32 %v275_v27, %v274_v26  ;;  %v279_v37 = vmul.f32 %v1583_v31, %v1583_v31  ;;  %v1597_v39 = vld [vmem:[%s1507_s30 + $0x98] sm:$0xff]  ;;  %v1600_v40 = vld [vmem:[%s1507_s30 + $0x80] sm:$0xff]  ;;  %v1603_v41 = vld [vmem:[%s1507_s30 + $0x88] sm:$0xff]  ;;  %s1320_s11 = scalar_lea.vmem %s1319_s5, 32768  ;;  %p1321_p8 = scmp.lt.s32.totalorder %s2302_s27, %s1319_s5 }
  0x42   : > { %v409_v32 = vadd.f32 %v277_v24, %v276_v23  ;;  %v284_v43 = vmul.f32 %v1594_v38, %v1594_v38  ;;  %v285_v44 = vmul.f32 %v1597_v39, %v1597_v39  ;;  %v282_v46 = vmul.f32 %v1600_v40, %v1600_v40  ;;  %v1614_v48 = vld [vmem:[%s1507_s30 + $0xb0] sm:$0xff]  ;;  %v1617_v49 = vld [vmem:[%s1507_s30 + $0xb8] sm:$0xff]  ;;  %v1620_v50 = vld [vmem:[%s1507_s30 + $0xa0] sm:$0xff]  ;;  %p1317_p12 = pneg %p1316_p11  ;;  %p1322_p9 = scmp.lt.s32.totalorder %s1320_s11, %s1314_s3 }
  0x43   : > { %v415_v42 = vadd.f32 %v281_v34, %v280_v33  ;;  %v412_v45 = vadd.f32 %v279_v37, %v278_v36  ;;  %v283_v47 = vmul.f32 %v1603_v41, %v1603_v41  ;;  %v1623_v51 = vld [vmem:[%s1507_s30 + $0xa8] sm:$0xff]  ;;  %v288_v53 = vmul.f32 %v1614_v48, %v1614_v48  ;;  %v1634_v58 = vld [vmem:[%s1507_s30 + $0xd0] sm:$0xff]  ;;  %v1637_v59 = vld [vmem:[%s1507_s30 + $0xd8] sm:$0xff] }
  0x44   : > { %404 = vadd.xlane.f32.xlu1 %v403_v22  ;;  %v421_v52 = vadd.f32 %v285_v44, %v284_v43  ;;  %v289_v54 = vmul.f32 %v1617_v49, %v1617_v49  ;;  %v286_v56 = vmul.f32 %v1620_v50, %v1620_v50  ;;  %v287_v57 = vmul.f32 %v1623_v51, %v1623_v51  ;;  %v1640_v60 = vld [vmem:[%s1507_s30 + $0xc0] sm:$0xff]  ;;  %v1643_v61 = vld [vmem:[%s1507_s30 + $0xc8] sm:$0xff]  ;;  %v1654_v10 = vld [vmem:[%s1507_s30 + $0xf0] sm:$0xff]  ;;  %p1323_p13 = por %p1322_p9, %p1321_p8 }
  0x45   : > { %398 = vadd.xlane.f32.xlu0 %v397_v25  ;;  %v418_v55 = vadd.f32 %v283_v47, %v282_v46  ;;  %v292_v63 = vmul.f32 %v1634_v58, %v1634_v58  ;;  %v293_v3 = vmul.f32 %v1637_v59, %v1637_v59  ;;  %v290_v6 = vmul.f32 %v1640_v60, %v1640_v60  ;;  %v1657_v11 = vld [vmem:[%s1507_s30 + $0xf8] sm:$0xff]  ;;  %v1660_v15 = vld [vmem:[%s1507_s30 + $0xe0] sm:$0xff]  ;;  %v1663_v16 = vld [vmem:[%s1507_s30 + $0xe8] sm:$0xff] }
  0x46   : > { %v427_v62 = vadd.f32 %v289_v54, %v288_v53  ;;  %v424_v4 = vadd.f32 %v287_v57, %v286_v56  ;;  %v291_v9 = vmul.f32 %v1643_v61, %v1643_v61  ;;  %v296_v21 = vmul.f32 %v1654_v10, %v1654_v10  ;;  %v1674_v26 = vld [vmem:[%s1507_s30 + $0x110] sm:$0xff]  ;;  %v1677_v27 = vld [vmem:[%s1507_s30 + $0x118] sm:$0xff]  ;;  %v1683_v33 = vld [vmem:[%s1507_s30 + $0x108] sm:$0xff]  ;;  %p1324_p1 = pnand %p1323_p13, %p1317_p12 }
  0x47   : > { %v433_v17 = vadd.f32 %v293_v3, %v292_v63  ;;  %v297_v22 = vmul.f32 %v1657_v11, %v1657_v11  ;;  %v294_v24 = vmul.f32 %v1660_v15, %v1660_v15  ;;  %v295_v25 = vmul.f32 %v1663_v16, %v1663_v16  ;;  %v1694_v44 = vld [vmem:[%s1507_s30 + $0x130] sm:$0xff]  ;;  %v1700_v46 = vld [vmem:[%s1507_s30 + $0x120] sm:$0xff]  ;;  %v1703_v47 = vld [vmem:[%s1507_s30 + $0x128] sm:$0xff] }
  0x48   : > { %410 = vadd.xlane.f32.xlu1 %v409_v32  ;;  %v430_v23 = vadd.f32 %v291_v9, %v290_v6  ;;  %v1680_v32 = vld [vmem:[%s1507_s30 + $0x100] sm:$0xff]  ;;  %v301_v36 = vmul.f32 %v1677_v27, %v1677_v27  ;;  %v299_v43 = vmul.f32 %v1683_v33, %v1683_v33  ;;  %2421 = vst [vmem:[#allocation8_spill] sm:$0xff] %v1700_v46  ;;  %2422 = vst [vmem:[#allocation9_spill] sm:$0xff] %v1703_v47  ;;  %v1717_v63 = vld [vmem:[%s1507_s30 + $0x158] sm:$0xff] }
  0x49   : > { %407 = vadd.xlane.f32.xlu0 %v406_v35  ;;  %v439_v34 = vadd.f32 %v297_v22, %v296_v21  ;;  %v300_v35 = vmul.f32 %v1674_v26, %v1674_v26  ;;  %v436_v37 = vadd.f32 %v295_v25, %v294_v24  ;;  %v304_v53 = vmul.f32 %v1694_v44, %v1694_v44  ;;  %v1720_v3 = vld [vmem:[%s1507_s30 + $0x140] sm:$0xff]  ;;  %v1734_v24 = vld [vmem:[%s1507_s30 + $0x170] sm:$0xff]  ;;  %v1737_v25 = vld [vmem:[%s1507_s30 + $0x178] sm:$0xff] }
  0x4a   : > { %v302_v56 = vmul.f32 %v1700_v46, %v1700_v46  ;;  %v303_v57 = vmul.f32 %v1703_v47, %v1703_v47  ;;  %2424 = vst [vmem:[#allocation11_spill] sm:$0xff] %v1717_v63  ;;  %2425 = vst [vmem:[#allocation12_spill] sm:$0xff] %v1720_v3  ;;  %v306_v22 = vmul.f32 %v1720_v3, %v1720_v3 }
  0x4b   : > { %2427 = vst [vmem:[#allocation14_spill] sm:$0xff] %v1734_v24  ;;  %2428 = vst [vmem:[#allocation15_spill] sm:$0xff] %v1737_v25 }
  0x4c   : > { %416 = vadd.xlane.f32.xlu1 %v415_v42  ;;  %v298_v42 = vmul.f32 %v1680_v32, %v1680_v32  ;;  %v448_v21 = vadd.f32 %v303_v57, %v302_v56  ;;  %v1760_v56 = vld [vmem:[%s1507_s30 + $0x180] sm:$0xff]  ;;  %v1763_v57 = vld [vmem:[%s1507_s30 + $0x188] sm:$0xff] }
  0x4d   : > { %413 = vadd.xlane.f32.xlu0 %v412_v45  ;;  %v1697_v45 = vld [vmem:[%s1507_s30 + $0x138] sm:$0xff]  ;;  %2433 = vst [vmem:[#allocation20_spill] sm:$0xff] %v1760_v56  ;;  %2434 = vst [vmem:[#allocation21_spill] sm:$0xff] %v1763_v57 }
  0x4e   : > { %v305_v54 = vmul.f32 %v1697_v45, %v1697_v45 }
  0x50   : > { %422 = vadd.xlane.f32.xlu1 %v421_v52  ;;  %v445_v52 = vadd.f32 %v301_v36, %v300_v35  ;;  %v451_v6 = vadd.f32 %v305_v54, %v304_v53  ;;  %v1743_v35 = vld [vmem:[%s1507_s30 + $0x168] sm:$0xff]  ;;  %v1754_v54 = vld [vmem:[%s1507_s30 + $0x190] sm:$0xff] }
  0x51   : > { %419 = vadd.xlane.f32.xlu0 %v418_v55  ;;  %v442_v55 = vadd.f32 %v299_v43, %v298_v42  ;;  %2430 = vst [vmem:[#allocation17_spill] sm:$0xff] %v1743_v35  ;;  %v313_v42 = vmul.f32 %v1737_v25, %v1737_v25  ;;  %v311_v53 = vmul.f32 %v1743_v35, %v1743_v35  ;;  %2431 = vst [vmem:[#allocation18_spill] sm:$0xff] %v1754_v54  ;;  %v239_v35 = vld [vmem:[%s1507_s30 + $0x328] sm:$0xff]  ;;  %v245_v25 = vld [vmem:[%s1507_s30 + $0x358] sm:$0xff] }
  0x54   : > { %428 = vadd.xlane.f32.xlu1 %v427_v62  ;;  %v1714_v62 = vld [vmem:[%s1507_s30 + $0x150] sm:$0xff] }
  0x55   : > { %425 = vadd.xlane.f32.xlu0 %v424_v4  ;;  %2423 = vst [vmem:[#allocation10_spill] sm:$0xff] %v1714_v62  ;;  %v1723_v4 = vld [vmem:[%s1507_s30 + $0x148] sm:$0xff]  ;;  %v308_v9 = vmul.f32 %v1714_v62, %v1714_v62 }
  0x56   : > { %2426 = vst [vmem:[#allocation13_spill] sm:$0xff] %v1723_v4 }
  0x58   : > { %434 = vadd.xlane.f32.xlu1 %v433_v17  ;;  %v309_v17 = vmul.f32 %v1717_v63, %v1717_v63  ;;  %v373_v63 = vmul.f32 %v245_v25, %v245_v25 }
  0x59   : > { %431 = vadd.xlane.f32.xlu0 %v430_v23  ;;  %v307_v23 = vmul.f32 %v1723_v4, %v1723_v4 }
  0x5a   : > { %v457_v36 = vadd.f32 %v309_v17, %v308_v9  ;;  %v316_v9 = vmul.f32 %v1754_v54, %v1754_v54  ;;  %v1783_v54 = vld [vmem:[%s1507_s30 + $0x1a8] sm:$0xff] }
  0x5b   : > { %v454_v43 = vadd.f32 %v307_v23, %v306_v22  ;;  %v314_v22 = vmul.f32 %v1760_v56, %v1760_v56  ;;  %v315_v23 = vmul.f32 %v1763_v57, %v1763_v57  ;;  %2438 = vst [vmem:[#allocation25_spill] sm:$0xff] %v1783_v54 }
  0x5c   : > { %440 = vadd.xlane.f32.xlu1 %v439_v34  ;;  %v1740_v34 = vld [vmem:[%s1507_s30 + $0x160] sm:$0xff] }
  0x5d   : > { %437 = vadd.xlane.f32.xlu0 %v436_v37  ;;  %2429 = vst [vmem:[#allocation16_spill] sm:$0xff] %v1740_v34  ;;  %v312_v37 = vmul.f32 %v1734_v24, %v1734_v24  ;;  %v466_v57 = vadd.f32 %v315_v23, %v314_v22  ;;  %v243_v24 = vld [vmem:[%s1507_s30 + $0x348] sm:$0xff] }
  0x60   : > { %446 = vadd.xlane.f32.xlu1 %v445_v52  ;;  %v310_v52 = vmul.f32 %v1740_v34, %v1740_v34 }
  0x61   : > { %443 = vadd.xlane.f32.xlu0 %v442_v55  ;;  %v1757_v55 = vld [vmem:[%s1507_s30 + $0x198] sm:$0xff] }
  0x62   : > { %2432 = vst [vmem:[#allocation19_spill] sm:$0xff] %v1757_v55  ;;  %v317_v17 = vmul.f32 %v1757_v55, %v1757_v55  ;;  %v319_v55 = vmul.f32 %v1783_v54, %v1783_v54 }
  0x64   : > { %452 = vadd.xlane.f32.xlu1 %v451_v6  ;;  %v463_v6 = vadd.f32 %v313_v42, %v312_v37  ;;  %v1777_v37 = vld [vmem:[%s1507_s30 + $0x1b8] sm:$0xff]  ;;  %v1780_v42 = vld [vmem:[%s1507_s30 + $0x1a0] sm:$0xff] }
  0x65   : > { %449 = vadd.xlane.f32.xlu0 %v448_v21  ;;  %v460_v21 = vadd.f32 %v311_v53, %v310_v52  ;;  %2436 = vst [vmem:[#allocation23_spill] sm:$0xff] %v1777_v37  ;;  %2437 = vst [vmem:[#allocation24_spill] sm:$0xff] %v1780_v42  ;;  %v321_v53 = vmul.f32 %v1777_v37, %v1777_v37  ;;  %v318_v56 = vmul.f32 %v1780_v42, %v1780_v42 }
  0x67   : > { %v472_v54 = vadd.f32 %v319_v55, %v318_v56 }
  0x68   : > { %458 = vadd.xlane.f32.xlu1 %v457_v36  ;;  %v1774_v36 = vld [vmem:[%s1507_s30 + $0x1b0] sm:$0xff] }
  0x69   : > { %455 = vadd.xlane.f32.xlu0 %v454_v43  ;;  %2435 = vst [vmem:[#allocation22_spill] sm:$0xff] %v1774_v36  ;;  %v469_v43 = vadd.f32 %v317_v17, %v316_v9  ;;  %v320_v52 = vmul.f32 %v1774_v36, %v1774_v36  ;;  %v1797_v9 = vld [vmem:[%s1507_s30 + $0x1d8] sm:$0xff]  ;;  %v1800_v17 = vld [vmem:[%s1507_s30 + $0x1c0] sm:$0xff]  ;;  %v1803_v36 = vld [vmem:[%s1507_s30 + $0x1c8] sm:$0xff] }
  0x6a   : > { %2440 = vst [vmem:[#allocation27_spill] sm:$0xff] %v1797_v9  ;;  %2441 = vst [vmem:[#allocation28_spill] sm:$0xff] %v1800_v17  ;;  %v325_v23 = vmul.f32 %v1797_v9, %v1797_v9  ;;  %v322_v42 = vmul.f32 %v1800_v17, %v1800_v17  ;;  %v323_v37 = vmul.f32 %v1803_v36, %v1803_v36 }
  0x6b   : > { %2442 = vst [vmem:[#allocation29_spill] sm:$0xff] %v1803_v36 }
  0x6c   : > { %464 = vadd.xlane.f32.xlu1 %v463_v6  ;;  %v1794_v6 = vld [vmem:[%s1507_s30 + $0x1d0] sm:$0xff]  ;;  %v478_v36 = vadd.f32 %v323_v37, %v322_v42 }
  0x6d   : > { %461 = vadd.xlane.f32.xlu0 %v460_v21  ;;  %2439 = vst [vmem:[#allocation26_spill] sm:$0xff] %v1794_v6  ;;  %v475_v21 = vadd.f32 %v321_v53, %v320_v52  ;;  %v324_v22 = vmul.f32 %v1794_v6, %v1794_v6  ;;  %v1817_v52 = vld [vmem:[%s1507_s30 + $0x1f8] sm:$0xff]  ;;  %v1820_v53 = vld [vmem:[%s1507_s30 + $0x1e0] sm:$0xff]  ;;  %v1823_v6 = vld [vmem:[%s1507_s30 + $0x1e8] sm:$0xff] }
  0x6e   : > { %2444 = vst [vmem:[#allocation31_spill] sm:$0xff] %v1817_v52  ;;  %2445 = vst [vmem:[#allocation32_spill] sm:$0xff] %v1820_v53  ;;  %v329_v56 = vmul.f32 %v1817_v52, %v1817_v52  ;;  %v326_v17 = vmul.f32 %v1820_v53, %v1820_v53  ;;  %v327_v9 = vmul.f32 %v1823_v6, %v1823_v6 }
  0x6f   : > { %2446 = vst [vmem:[#allocation33_spill] sm:$0xff] %v1823_v6 }
  0x70   : > { %470 = vadd.xlane.f32.xlu1 %v469_v43  ;;  %v1814_v43 = vld [vmem:[%s1507_s30 + $0x1f0] sm:$0xff]  ;;  %v484_v6 = vadd.f32 %v327_v9, %v326_v17 }
  0x71   : > { %467 = vadd.xlane.f32.xlu0 %v466_v57  ;;  %2443 = vst [vmem:[#allocation30_spill] sm:$0xff] %v1814_v43  ;;  %v481_v57 = vadd.f32 %v325_v23, %v324_v22  ;;  %v328_v55 = vmul.f32 %v1814_v43, %v1814_v43  ;;  %v1837_v22 = vld [vmem:[%s1507_s30 + $0x218] sm:$0xff]  ;;  %v1840_v23 = vld [vmem:[%s1507_s30 + $0x200] sm:$0xff]  ;;  %v1843_v43 = vld [vmem:[%s1507_s30 + $0x208] sm:$0xff] }
  0x72   : > { %2448 = vst [vmem:[#allocation35_spill] sm:$0xff] %v1837_v22  ;;  %2449 = vst [vmem:[#allocation36_spill] sm:$0xff] %v1840_v23  ;;  %v333_v42 = vmul.f32 %v1837_v22, %v1837_v22  ;;  %v330_v53 = vmul.f32 %v1840_v23, %v1840_v23  ;;  %v331_v52 = vmul.f32 %v1843_v43, %v1843_v43 }
  0x73   : > { %2450 = vst [vmem:[#allocation37_spill] sm:$0xff] %v1843_v43 }
  0x74   : > { %476 = vadd.xlane.f32.xlu1 %v475_v21  ;;  %v1834_v21 = vld [vmem:[%s1507_s30 + $0x210] sm:$0xff]  ;;  %v490_v43 = vadd.f32 %v331_v52, %v330_v53 }
  0x75   : > { %473 = vadd.xlane.f32.xlu0 %v472_v54  ;;  %2447 = vst [vmem:[#allocation34_spill] sm:$0xff] %v1834_v21  ;;  %v487_v54 = vadd.f32 %v329_v56, %v328_v55  ;;  %v332_v37 = vmul.f32 %v1834_v21, %v1834_v21  ;;  %v1857_v55 = vld [vmem:[%s1507_s30 + $0x238] sm:$0xff]  ;;  %v1860_v56 = vld [vmem:[%s1507_s30 + $0x220] sm:$0xff]  ;;  %v1863_v21 = vld [vmem:[%s1507_s30 + $0x228] sm:$0xff] }
  0x76   : > { %2452 = vst [vmem:[#allocation39_spill] sm:$0xff] %v1857_v55  ;;  %2453 = vst [vmem:[#allocation40_spill] sm:$0xff] %v1860_v56  ;;  %v337_v17 = vmul.f32 %v1857_v55, %v1857_v55  ;;  %v334_v23 = vmul.f32 %v1860_v56, %v1860_v56  ;;  %v335_v22 = vmul.f32 %v1863_v21, %v1863_v21 }
  0x77   : > { %2454 = vst [vmem:[#allocation41_spill] sm:$0xff] %v1863_v21 }
  0x78   : > { %482 = vadd.xlane.f32.xlu1 %v481_v57  ;;  %v1854_v57 = vld [vmem:[%s1507_s30 + $0x230] sm:$0xff]  ;;  %v496_v21 = vadd.f32 %v335_v22, %v334_v23 }
  0x79   : > { %479 = vadd.xlane.f32.xlu0 %v478_v36  ;;  %2451 = vst [vmem:[#allocation38_spill] sm:$0xff] %v1854_v57  ;;  %v493_v36 = vadd.f32 %v333_v42, %v332_v37  ;;  %v336_v9 = vmul.f32 %v1854_v57, %v1854_v57  ;;  %v1877_v37 = vld [vmem:[%s1507_s30 + $0x258] sm:$0xff]  ;;  %v1880_v42 = vld [vmem:[%s1507_s30 + $0x240] sm:$0xff]  ;;  %v1883_v57 = vld [vmem:[%s1507_s30 + $0x248] sm:$0xff] }
  0x7a   : > { %2456 = vst [vmem:[#allocation43_spill] sm:$0xff] %v1877_v37  ;;  %2457 = vst [vmem:[#allocation44_spill] sm:$0xff] %v1880_v42  ;;  %v341_v53 = vmul.f32 %v1877_v37, %v1877_v37  ;;  %v338_v56 = vmul.f32 %v1880_v42, %v1880_v42  ;;  %v339_v55 = vmul.f32 %v1883_v57, %v1883_v57 }
  0x7b   : > { %2458 = vst [vmem:[#allocation45_spill] sm:$0xff] %v1883_v57 }
  0x7c   : > { %488 = vadd.xlane.f32.xlu1 %v487_v54  ;;  %v1874_v54 = vld [vmem:[%s1507_s30 + $0x250] sm:$0xff]  ;;  %v502_v57 = vadd.f32 %v339_v55, %v338_v56 }
  0x7d   : > { %485 = vadd.xlane.f32.xlu0 %v484_v6  ;;  %2455 = vst [vmem:[#allocation42_spill] sm:$0xff] %v1874_v54  ;;  %v499_v6 = vadd.f32 %v337_v17, %v336_v9  ;;  %v340_v52 = vmul.f32 %v1874_v54, %v1874_v54  ;;  %v1897_v9 = vld [vmem:[%s1507_s30 + $0x278] sm:$0xff]  ;;  %v1900_v17 = vld [vmem:[%s1507_s30 + $0x260] sm:$0xff]  ;;  %v1903_v54 = vld [vmem:[%s1507_s30 + $0x268] sm:$0xff] }
  0x7e   : > { %2460 = vst [vmem:[#allocation47_spill] sm:$0xff] %v1897_v9  ;;  %2461 = vst [vmem:[#allocation48_spill] sm:$0xff] %v1900_v17  ;;  %v345_v23 = vmul.f32 %v1897_v9, %v1897_v9  ;;  %v342_v42 = vmul.f32 %v1900_v17, %v1900_v17  ;;  %v343_v37 = vmul.f32 %v1903_v54, %v1903_v54 }
  0x7f   : > { %2462 = vst [vmem:[#allocation49_spill] sm:$0xff] %v1903_v54 }
  0x80   : > { %494 = vadd.xlane.f32.xlu1 %v493_v36  ;;  %v1894_v36 = vld [vmem:[%s1507_s30 + $0x270] sm:$0xff]  ;;  %v508_v54 = vadd.f32 %v343_v37, %v342_v42 }
  0x81   : > { %491 = vadd.xlane.f32.xlu0 %v490_v43  ;;  %2459 = vst [vmem:[#allocation46_spill] sm:$0xff] %v1894_v36  ;;  %v505_v43 = vadd.f32 %v341_v53, %v340_v52  ;;  %v344_v22 = vmul.f32 %v1894_v36, %v1894_v36  ;;  %v1917_v52 = vld [vmem:[%s1507_s30 + $0x298] sm:$0xff]  ;;  %v1920_v53 = vld [vmem:[%s1507_s30 + $0x280] sm:$0xff]  ;;  %v1923_v36 = vld [vmem:[%s1507_s30 + $0x288] sm:$0xff] }
  0x82   : > { %2464 = vst [vmem:[#allocation51_spill] sm:$0xff] %v1917_v52  ;;  %2465 = vst [vmem:[#allocation52_spill] sm:$0xff] %v1920_v53  ;;  %v349_v56 = vmul.f32 %v1917_v52, %v1917_v52  ;;  %v346_v17 = vmul.f32 %v1920_v53, %v1920_v53  ;;  %v347_v9 = vmul.f32 %v1923_v36, %v1923_v36 }
  0x83   : > { %2466 = vst [vmem:[#allocation53_spill] sm:$0xff] %v1923_v36 }
  0x84   : > { %500 = vadd.xlane.f32.xlu1 %v499_v6  ;;  %v1914_v6 = vld [vmem:[%s1507_s30 + $0x290] sm:$0xff]  ;;  %v514_v36 = vadd.f32 %v347_v9, %v346_v17 }
  0x85   : > { %497 = vadd.xlane.f32.xlu0 %v496_v21  ;;  %2463 = vst [vmem:[#allocation50_spill] sm:$0xff] %v1914_v6  ;;  %v511_v21 = vadd.f32 %v345_v23, %v344_v22  ;;  %v348_v55 = vmul.f32 %v1914_v6, %v1914_v6  ;;  %v1937_v22 = vld [vmem:[%s1507_s30 + $0x2b8] sm:$0xff]  ;;  %v1940_v23 = vld [vmem:[%s1507_s30 + $0x2a0] sm:$0xff]  ;;  %v1943_v6 = vld [vmem:[%s1507_s30 + $0x2a8] sm:$0xff] }
  0x86   : > { %2468 = vst [vmem:[#allocation55_spill] sm:$0xff] %v1937_v22  ;;  %2469 = vst [vmem:[#allocation56_spill] sm:$0xff] %v1940_v23  ;;  %v353_v42 = vmul.f32 %v1937_v22, %v1937_v22  ;;  %v350_v53 = vmul.f32 %v1940_v23, %v1940_v23  ;;  %v351_v52 = vmul.f32 %v1943_v6, %v1943_v6 }
  0x87   : > { %2470 = vst [vmem:[#allocation57_spill] sm:$0xff] %v1943_v6 }
  0x88   : > { %506 = vadd.xlane.f32.xlu1 %v505_v43  ;;  %v1934_v43 = vld [vmem:[%s1507_s30 + $0x2b0] sm:$0xff]  ;;  %v520_v6 = vadd.f32 %v351_v52, %v350_v53 }
  0x89   : > { %503 = vadd.xlane.f32.xlu0 %v502_v57  ;;  %2467 = vst [vmem:[#allocation54_spill] sm:$0xff] %v1934_v43  ;;  %v517_v57 = vadd.f32 %v349_v56, %v348_v55  ;;  %v352_v37 = vmul.f32 %v1934_v43, %v1934_v43  ;;  %v1957_v55 = vld [vmem:[%s1507_s30 + $0x2d8] sm:$0xff]  ;;  %v1960_v56 = vld [vmem:[%s1507_s30 + $0x2c0] sm:$0xff]  ;;  %v1963_v43 = vld [vmem:[%s1507_s30 + $0x2c8] sm:$0xff] }
  0x8a   : > { %2472 = vst [vmem:[#allocation59_spill] sm:$0xff] %v1957_v55  ;;  %2473 = vst [vmem:[#allocation60_spill] sm:$0xff] %v1960_v56  ;;  %v357_v17 = vmul.f32 %v1957_v55, %v1957_v55  ;;  %v354_v23 = vmul.f32 %v1960_v56, %v1960_v56  ;;  %v355_v22 = vmul.f32 %v1963_v43, %v1963_v43 }
  0x8b   : > { %2474 = vst [vmem:[#allocation61_spill] sm:$0xff] %v1963_v43 }
  0x8c   : > { %512 = vadd.xlane.f32.xlu1 %v511_v21  ;;  %v1954_v21 = vld [vmem:[%s1507_s30 + $0x2d0] sm:$0xff]  ;;  %v526_v43 = vadd.f32 %v355_v22, %v354_v23 }
  0x8d   : > { %509 = vadd.xlane.f32.xlu0 %v508_v54  ;;  %2471 = vst [vmem:[#allocation58_spill] sm:$0xff] %v1954_v21  ;;  %v523_v54 = vadd.f32 %v353_v42, %v352_v37  ;;  %v356_v9 = vmul.f32 %v1954_v21, %v1954_v21  ;;  %v1977_v37 = vld [vmem:[%s1507_s30 + $0x2f8] sm:$0xff]  ;;  %v1980_v42 = vld [vmem:[%s1507_s30 + $0x2e0] sm:$0xff]  ;;  %v1983_v21 = vld [vmem:[%s1507_s30 + $0x2e8] sm:$0xff] }
  0x8e   : > { %2476 = vst [vmem:[#allocation63_spill] sm:$0xff] %v1977_v37  ;;  %2477 = vst [vmem:[#allocation64_spill] sm:$0xff] %v1980_v42  ;;  %v361_v53 = vmul.f32 %v1977_v37, %v1977_v37  ;;  %v358_v56 = vmul.f32 %v1980_v42, %v1980_v42  ;;  %v359_v55 = vmul.f32 %v1983_v21, %v1983_v21 }
  0x8f   : > { %2478 = vst [vmem:[#allocation65_spill] sm:$0xff] %v1983_v21 }
  0x90   : > { %518 = vadd.xlane.f32.xlu1 %v517_v57  ;;  %v1974_v57 = vld [vmem:[%s1507_s30 + $0x2f0] sm:$0xff]  ;;  %v532_v21 = vadd.f32 %v359_v55, %v358_v56  ;;  %v367_v56 = vmul.f32 %v239_v35, %v239_v35  ;;  %v246_v35 = vld [vmem:[%s1507_s30 + $0x360] sm:$0xff] }
  0x91   : > { %515 = vadd.xlane.f32.xlu0 %v514_v36  ;;  %2475 = vst [vmem:[#allocation62_spill] sm:$0xff] %v1974_v57  ;;  %v529_v36 = vadd.f32 %v357_v17, %v356_v9  ;;  %v360_v52 = vmul.f32 %v1974_v57, %v1974_v57  ;;  %v1997_v9 = vld [vmem:[%s1507_s30 + $0x318] sm:$0xff]  ;;  %v2000_v17 = vld [vmem:[%s1507_s30 + $0x300] sm:$0xff]  ;;  %v2003_v57 = vld [vmem:[%s1507_s30 + $0x308] sm:$0xff]  ;;  %v374_v25 = vmul.f32 %v246_v35, %v246_v35 }
  0x92   : > { %2480 = vst [vmem:[#allocation67_spill] sm:$0xff] %v1997_v9  ;;  %2481 = vst [vmem:[#allocation68_spill] sm:$0xff] %v2000_v17  ;;  %v365_v23 = vmul.f32 %v1997_v9, %v1997_v9  ;;  %v362_v42 = vmul.f32 %v2000_v17, %v2000_v17  ;;  %v363_v37 = vmul.f32 %v2003_v57, %v2003_v57  ;;  %v244_v17 = vld [vmem:[%s1507_s30 + $0x350] sm:$0xff] }
  0x93   : > { %2482 = vst [vmem:[#allocation69_spill] sm:$0xff] %v2003_v57  ;;  %v242_v57 = vld [vmem:[%s1507_s30 + $0x340] sm:$0xff]  ;;  %v372_v3 = vmul.f32 %v244_v17, %v244_v17  ;;  %v251_v17 = vld [vmem:[%s1507_s30 + $0x388] sm:$0xff] }
  0x94   : > { %524 = vadd.xlane.f32.xlu1 %v523_v54  ;;  %v1994_v54 = vld [vmem:[%s1507_s30 + $0x310] sm:$0xff] }
  0x95   : > { %521 = vadd.xlane.f32.xlu0 %v520_v6  ;;  %2479 = vst [vmem:[#allocation66_spill] sm:$0xff] %v1994_v54  ;;  %v535_v6 = vadd.f32 %v361_v53, %v360_v52  ;;  %v364_v22 = vmul.f32 %v1994_v54, %v1994_v54  ;;  %v241_v52 = vld [vmem:[%s1507_s30 + $0x338] sm:$0xff]  ;;  %v238_v53 = vld [vmem:[%s1507_s30 + $0x320] sm:$0xff] }
  0x96   : > { %v369_v9 = vmul.f32 %v241_v52, %v241_v52  ;;  %v366_v55 = vmul.f32 %v238_v53, %v238_v53 }
  0x97   : > { %v541_v54 = vadd.f32 %v365_v23, %v364_v22  ;;  %v249_v22 = vld [vmem:[%s1507_s30 + $0x378] sm:$0xff]  ;;  %v247_v23 = vld [vmem:[%s1507_s30 + $0x368] sm:$0xff] }
  0x98   : > { %530 = vadd.xlane.f32.xlu1 %v529_v36  ;;  %v240_v36 = vld [vmem:[%s1507_s30 + $0x330] sm:$0xff]  ;;  %v377_v53 = vmul.f32 %v249_v22, %v249_v22 }
  0x99   : > { %527 = vadd.xlane.f32.xlu0 %v526_v43  ;;  %v368_v34 = vmul.f32 %v240_v36, %v240_v36  ;;  %v538_v43 = vadd.f32 %v363_v37, %v362_v42  ;;  %v371_v37 = vmul.f32 %v243_v24, %v243_v24  ;;  %v248_v42 = vld [vmem:[%s1507_s30 + $0x370] sm:$0xff]  ;;  %v553_v36 = vadd.f32 %v373_v63, %v372_v3  ;;  %v250_v24 = vld [vmem:[%s1507_s30 + $0x380] sm:$0xff] }
  0x9a   : > { %v376_v52 = vmul.f32 %v248_v42, %v248_v42  ;;  %v378_v3 = vmul.f32 %v250_v24, %v250_v24  ;;  %v255_v42 = vld [vmem:[%s1507_s30 + $0x3a8] sm:$0xff] }
  0x9b   : > { %v547_v4 = vadd.f32 %v369_v9, %v368_v34  ;;  %v253_v9 = vld [vmem:[%s1507_s30 + $0x398] sm:$0xff] }
  0x9c   : > { %536 = vadd.xlane.f32.xlu1 %v535_v6  ;;  %v544_v6 = vadd.f32 %v367_v56, %v366_v55  ;;  %v381_v56 = vmul.f32 %v253_v9, %v253_v9 }
  0x9d   : > { %533 = vadd.xlane.f32.xlu0 %v532_v21  ;;  %v370_v21 = vmul.f32 %v242_v57, %v242_v57  ;;  %v252_v57 = vld [vmem:[%s1507_s30 + $0x390] sm:$0xff] }
  0x9e   : > { %v380_v55 = vmul.f32 %v252_v57, %v252_v57  ;;  %v259_v57 = vld [vmem:[%s1507_s30 + $0x3c8] sm:$0xff] }
  0x9f   : > { %v550_v34 = vadd.f32 %v371_v37, %v370_v21  ;;  %v257_v21 = vld [vmem:[%s1507_s30 + $0x3b8] sm:$0xff]  ;;  %v254_v37 = vld [vmem:[%s1507_s30 + $0x3a0] sm:$0xff] }
  0xa0   : > { %542 = vadd.xlane.f32.xlu1 %v541_v54  ;;  %v375_v54 = vmul.f32 %v247_v23, %v247_v23  ;;  %v565_v22 = vadd.f32 %v381_v56, %v380_v55  ;;  %v385_v23 = vmul.f32 %v257_v21, %v257_v21  ;;  %v387_v56 = vmul.f32 %v259_v57, %v259_v57 }
  0xa1   : > { %539 = vadd.xlane.f32.xlu0 %v538_v43  ;;  %v559_v43 = vadd.f32 %v377_v53, %v376_v52  ;;  %v382_v52 = vmul.f32 %v254_v37, %v254_v37  ;;  %v383_v53 = vmul.f32 %v255_v42, %v255_v42 }
  0xa2   : > { %v556_v63 = vadd.f32 %v375_v54, %v374_v25  ;;  %v261_v25 = vld [vmem:[%s1507_s30 + $0x3d8] sm:$0xff]  ;;  %v258_v54 = vld [vmem:[%s1507_s30 + $0x3c0] sm:$0xff] }
  0xa3   : > { %v386_v55 = vmul.f32 %v258_v54, %v258_v54 }
  0xa4   : > { %548 = vadd.xlane.f32.xlu1 %v547_v4  ;;  %v379_v4 = vmul.f32 %v251_v17, %v251_v17  ;;  %v389_v17 = vmul.f32 %v261_v25, %v261_v25 }
  0xa5   : > { %545 = vadd.xlane.f32.xlu0 %v544_v6  ;;  %v256_v6 = vld [vmem:[%s1507_s30 + $0x3b0] sm:$0xff]  ;;  %v574_v62 = vadd.f32 %v387_v56, %v386_v55 }
  0xa6   : > { %v384_v35 = vmul.f32 %v256_v6, %v256_v6  ;;  %v265_v6 = vld [vmem:[%s1507_s30 + $0x3f8] sm:$0xff] }
  0xa7   : > { %v393_v42 = vmul.f32 %v265_v6, %v265_v6 }
  0xa8   : > { %554 = vadd.xlane.f32.xlu1 %v553_v36  ;;  %v562_v36 = vadd.f32 %v379_v4, %v378_v3  ;;  %v571_v9 = vadd.f32 %v385_v23, %v384_v35  ;;  %v262_v3 = vld [vmem:[%s1507_s30 + $0x3e0] sm:$0xff]  ;;  %v263_v4 = vld [vmem:[%s1507_s30 + $0x3e8] sm:$0xff] }
  0xa9   : > { %551 = vadd.xlane.f32.xlu0 %v550_v34  ;;  %v260_v34 = vld [vmem:[%s1507_s30 + $0x3d0] sm:$0xff]  ;;  %v390_v47 = vmul.f32 %v262_v3, %v262_v3  ;;  %v391_v46 = vmul.f32 %v263_v4, %v263_v4 }
  0xaa   : > { %v388_v24 = vmul.f32 %v260_v34, %v260_v34 }
  0xab   : > { %v580_v35 = vadd.f32 %v391_v46, %v390_v47 }
  0xac   : > { %560 = vadd.xlane.f32.xlu1 %v559_v43  ;;  %v568_v43 = vadd.f32 %v383_v53, %v382_v52  ;;  %v577_v21 = vadd.f32 %v389_v17, %v388_v24 }
  0xad   : > { %557 = vadd.xlane.f32.xlu0 %v556_v63  ;;  %v264_v63 = vld [vmem:[%s1507_s30 + $0x3f0] sm:$0xff] }
  0xae   : > { %v392_v37 = vmul.f32 %v264_v63, %v264_v63 }
  0xb0   : > { %566 = vadd.xlane.f32.xlu1 %v565_v22  ;;  %v583_v22 = vadd.f32 %v393_v42, %v392_v37 }
  0xb1   : > { %563 = vadd.xlane.f32.xlu0 %v562_v36 }
  0xb4   : > { %572 = vadd.xlane.f32.xlu1 %v571_v9 }
  0xb5   : > { %569 = vadd.xlane.f32.xlu0 %v568_v43 }
  0xb8   : > { %578 = vadd.xlane.f32.xlu1 %v577_v21 }
  0xb9   : > { %575 = vadd.xlane.f32.xlu0 %v574_v62 }
  0xbc   : > { %584 = vadd.xlane.f32.xlu1 %v583_v22 }
  0xbd   : > { %581 = vadd.xlane.f32.xlu0 %v580_v35 }
  0xcd   : > { %v402_v23 = vpop.xlane.xlu1 %401 }
  0xce   : > { %v588_v36 = vmax.f32 %v402_v23, 1e-24  ;;  %v396_v52 = vpop.xlane.xlu0 %395 }
  0xcf   : > { %v586_v53 = vmax.f32 %v396_v52, 1e-24 }
  0xd0   : > { %1128 = vrsqrt.f32 %v588_v36 }
  0xd1   : > { %1130 = vrsqrt.f32 %v586_v53  ;;  %v405_v34 = vpop.xlane.xlu1 %404 }
  0xd2   : > { %v589_v25 = vmax.f32 %v405_v34, 1e-24  ;;  %v399_v54 = vpop.xlane.xlu0 %398 }
  0xd3   : > { %v587_v57 = vmax.f32 %v399_v54, 1e-24 }
  0xd4   : > { %1132 = vrsqrt.f32 %v589_v25 }
  0xd5   : > { %1134 = vrsqrt.f32 %v587_v57  ;;  %v411_v9 = vpop.xlane.xlu1 %410 }
  0xd6   : > { %v591_v24 = vmax.f32 %v411_v9, 1e-24  ;;  %v408_v17 = vpop.xlane.xlu0 %407 }
  0xd7   : > { %v590_v62 = vmax.f32 %v408_v17, 1e-24 }
  0xd8   : > { %1136 = vrsqrt.f32 %v591_v24 }
  0xd9   : > { %1138 = vrsqrt.f32 %v590_v62  ;;  %v417_v46 = vpop.xlane.xlu1 %416 }
  0xda   : > { %v1129_v47 = vpop.eup %1128  ;;  %v593_v43 = vmax.f32 %v417_v46, 1e-24  ;;  %v414_v55 = vpop.xlane.xlu0 %413 }
  0xdb   : > { %v1131_v56 = vpop.eup %1130  ;;  %v718_v63 = vmul.f32 %v1129_v47, %v1514_v0  ;;  %v719_v6 = vmul.f32 %v1129_v47, %v1517_v1  ;;  %v592_v3 = vmax.f32 %v414_v55, 1e-24 }
  0xdc   : > { %v714_v4 = vmul.f32 %v1131_v56, %v1520_v2  ;;  %v715_v21 = vmul.f32 %v1131_v56, %v1527_v5  ;;  %1140 = vrsqrt.f32 %v593_v43 }
  0xdd   : > { %846 = vst [vmem:[%s2047_s17 + $0x20] sm:$0xff] %v718_v63  ;;  %847 = vst [vmem:[%s2047_s17 + $0x28] sm:$0xff] %v719_v6  ;;  %1142 = vrsqrt.f32 %v592_v3  ;;  %v423_v0 = vpop.xlane.xlu1 %422 }
  0xde   : > { %v1133_v1 = vpop.eup %1132  ;;  %842 = vst [vmem:[%s2047_s17] sm:$0xff] %v714_v4  ;;  %843 = vst [vmem:[%s2047_s17 + $0x8] sm:$0xff] %v715_v21  ;;  %v595_v2 = vmax.f32 %v423_v0, 1e-24  ;;  %v420_v5 = vpop.xlane.xlu0 %419 }
  0xdf   : > { %v1135_v37 = vpop.eup %1134  ;;  %v720_v42 = vmul.f32 %v1133_v1, %v1532_v7  ;;  %v721_v22 = vmul.f32 %v1133_v1, %v1535_v8  ;;  %v594_v35 = vmax.f32 %v420_v5, 1e-24 }
  0xe0   : > { %v716_v23 = vmul.f32 %v1135_v37, %v1544_v12  ;;  %v717_v36 = vmul.f32 %v1135_v37, %v1547_v13  ;;  %1144 = vrsqrt.f32 %v595_v2 }
  0xe1   : > { %848 = vst [vmem:[%s2047_s17 + $0x30] sm:$0xff] %v720_v42  ;;  %849 = vst [vmem:[%s2047_s17 + $0x38] sm:$0xff] %v721_v22  ;;  %1146 = vrsqrt.f32 %v594_v35  ;;  %v429_v52 = vpop.xlane.xlu1 %428 }
  0xe2   : > { %v1137_v53 = vpop.eup %1136  ;;  %844 = vst [vmem:[%s2047_s17 + $0x10] sm:$0xff] %v716_v23  ;;  %845 = vst [vmem:[%s2047_s17 + $0x18] sm:$0xff] %v717_v36  ;;  %v597_v7 = vmax.f32 %v429_v52, 1e-24  ;;  %v426_v34 = vpop.xlane.xlu0 %425 }
  0xe3   : > { %v1139_v8 = vpop.eup %1138  ;;  %v724_v25 = vmul.f32 %v1137_v53, %v1550_v14  ;;  %v725_v12 = vmul.f32 %v1137_v53, %v1557_v18  ;;  %v596_v13 = vmax.f32 %v426_v34, 1e-24 }
  0xe4   : > { %v722_v54 = vmul.f32 %v1139_v8, %v1560_v19  ;;  %v723_v57 = vmul.f32 %v1139_v8, %v1563_v20  ;;  %1148 = vrsqrt.f32 %v597_v7 }
  0xe5   : > { %852 = vst [vmem:[%s2047_s17 + $0x50] sm:$0xff] %v724_v25  ;;  %853 = vst [vmem:[%s2047_s17 + $0x58] sm:$0xff] %v725_v12  ;;  %1150 = vrsqrt.f32 %v596_v13  ;;  %v435_v9 = vpop.xlane.xlu1 %434 }
  0xe6   : > { %v1141_v24 = vpop.eup %1140  ;;  %850 = vst [vmem:[%s2047_s17 + $0x40] sm:$0xff] %v722_v54  ;;  %851 = vst [vmem:[%s2047_s17 + $0x48] sm:$0xff] %v723_v57  ;;  %v599_v14 = vmax.f32 %v435_v9, 1e-24  ;;  %v432_v17 = vpop.xlane.xlu0 %431 }
  0xe7   : > { %v1143_v18 = vpop.eup %1142  ;;  %v728_v62 = vmul.f32 %v1141_v24, %v1574_v28  ;;  %v729_v19 = vmul.f32 %v1141_v24, %v1577_v29  ;;  %v598_v20 = vmax.f32 %v432_v17, 1e-24 }
  0xe8   : > { %v726_v46 = vmul.f32 %v1143_v18, %v1580_v30  ;;  %v727_v47 = vmul.f32 %v1143_v18, %v1583_v31  ;;  %1152 = vrsqrt.f32 %v599_v14 }
  0xe9   : > { %856 = vst [vmem:[%s2047_s17 + $0x70] sm:$0xff] %v728_v62  ;;  %857 = vst [vmem:[%s2047_s17 + $0x78] sm:$0xff] %v729_v19  ;;  %1154 = vrsqrt.f32 %v598_v20  ;;  %v441_v43 = vpop.xlane.xlu1 %440  ;;  %v2483_v19 = vld [vmem:[#allocation8_spill] sm:$0xff] }
  0xea   : > { %v1145_v55 = vpop.eup %1144  ;;  %854 = vst [vmem:[%s2047_s17 + $0x60] sm:$0xff] %v726_v46  ;;  %855 = vst [vmem:[%s2047_s17 + $0x68] sm:$0xff] %v727_v47  ;;  %v601_v28 = vmax.f32 %v441_v43, 1e-24  ;;  %v438_v56 = vpop.xlane.xlu0 %437  ;;  %v2484_v46 = vld [vmem:[#allocation9_spill] sm:$0xff] }
  0xeb   : > { %v1147_v29 = vpop.eup %1146  ;;  %v732_v63 = vmul.f32 %v1145_v55, %v1594_v38  ;;  %v733_v30 = vmul.f32 %v1145_v55, %v1597_v39  ;;  %v600_v31 = vmax.f32 %v438_v56, 1e-24  ;;  %v2485_v56 = vld [vmem:[#allocation10_spill] sm:$0xff] }
  0xec   : > { %v730_v6 = vmul.f32 %v1147_v29, %v1600_v40  ;;  %v731_v3 = vmul.f32 %v1147_v29, %v1603_v41  ;;  %1156 = vrsqrt.f32 %v601_v28 }
  0xed   : > { %860 = vst [vmem:[%s2047_s17 + $0x90] sm:$0xff] %v732_v63  ;;  %861 = vst [vmem:[%s2047_s17 + $0x98] sm:$0xff] %v733_v30  ;;  %1158 = vrsqrt.f32 %v600_v31  ;;  %v447_v4 = vpop.xlane.xlu1 %446  ;;  %v2486_v63 = vld [vmem:[#allocation11_spill] sm:$0xff] }
  0xee   : > { %v1149_v21 = vpop.eup %1148  ;;  %858 = vst [vmem:[%s2047_s17 + $0x80] sm:$0xff] %v730_v6  ;;  %859 = vst [vmem:[%s2047_s17 + $0x88] sm:$0xff] %v731_v3  ;;  %v603_v38 = vmax.f32 %v447_v4, 1e-24  ;;  %v444_v0 = vpop.xlane.xlu0 %443  ;;  %v2487_v6 = vld [vmem:[#allocation12_spill] sm:$0xff]  ;;  %v2488_v4 = vld [vmem:[#allocation13_spill] sm:$0xff] }
  0xef   : > { %v1151_v39 = vpop.eup %1150  ;;  %v736_v1 = vmul.f32 %v1149_v21, %v1614_v48  ;;  %v737_v40 = vmul.f32 %v1149_v21, %v1617_v49  ;;  %v602_v41 = vmax.f32 %v444_v0, 1e-24 }
  0xf0   : > { %v734_v2 = vmul.f32 %v1151_v39, %v1620_v50  ;;  %v735_v5 = vmul.f32 %v1151_v39, %v1623_v51  ;;  %1160 = vrsqrt.f32 %v603_v38 }
  0xf1   : > { %864 = vst [vmem:[%s2047_s17 + $0xb0] sm:$0xff] %v736_v1  ;;  %865 = vst [vmem:[%s2047_s17 + $0xb8] sm:$0xff] %v737_v40  ;;  %1162 = vrsqrt.f32 %v602_v41  ;;  %v453_v37 = vpop.xlane.xlu1 %452  ;;  %v2489_v41 = vld [vmem:[#allocation14_spill] sm:$0xff] }
  0xf2   : > { %v1153_v42 = vpop.eup %1152  ;;  %862 = vst [vmem:[%s2047_s17 + $0xa0] sm:$0xff] %v734_v2  ;;  %863 = vst [vmem:[%s2047_s17 + $0xa8] sm:$0xff] %v735_v5  ;;  %v605_v48 = vmax.f32 %v453_v37, 1e-24  ;;  %v450_v22 = vpop.xlane.xlu0 %449  ;;  %v2490_v5 = vld [vmem:[#allocation15_spill] sm:$0xff] }
  0xf3   : > { %v1155_v49 = vpop.eup %1154  ;;  %v740_v35 = vmul.f32 %v1153_v42, %v1634_v58  ;;  %v741_v50 = vmul.f32 %v1153_v42, %v1637_v59  ;;  %v604_v51 = vmax.f32 %v450_v22, 1e-24 }
  0xf4   : > { %v738_v23 = vmul.f32 %v1155_v49, %v1640_v60  ;;  %v739_v36 = vmul.f32 %v1155_v49, %v1643_v61  ;;  %1164 = vrsqrt.f32 %v605_v48  ;;  %v2491_v48 = vld [vmem:[#allocation16_spill] sm:$0xff]  ;;  %v2492_v49 = vld [vmem:[#allocation17_spill] sm:$0xff] }
  0xf5   : > { %868 = vst [vmem:[%s2047_s17 + $0xd0] sm:$0xff] %v740_v35  ;;  %869 = vst [vmem:[%s2047_s17 + $0xd8] sm:$0xff] %v741_v50  ;;  %1166 = vrsqrt.f32 %v604_v51  ;;  %v459_v52 = vpop.xlane.xlu1 %458 }
  0xf6   : > { %v1157_v53 = vpop.eup %1156  ;;  %866 = vst [vmem:[%s2047_s17 + $0xc0] sm:$0xff] %v738_v23  ;;  %867 = vst [vmem:[%s2047_s17 + $0xc8] sm:$0xff] %v739_v36  ;;  %v607_v58 = vmax.f32 %v459_v52, 1e-24  ;;  %v456_v7 = vpop.xlane.xlu0 %455 }
  0xf7   : > { %v1159_v59 = vpop.eup %1158  ;;  %v744_v34 = vmul.f32 %v1157_v53, %v1654_v10  ;;  %v745_v60 = vmul.f32 %v1157_v53, %v1657_v11  ;;  %v606_v61 = vmax.f32 %v456_v7, 1e-24  ;;  %v2493_v53 = vld [vmem:[#allocation18_spill] sm:$0xff]  ;;  %v2494_v7 = vld [vmem:[#allocation19_spill] sm:$0xff] }
  0xf8   : > { %v742_v8 = vmul.f32 %v1159_v59, %v1660_v15  ;;  %v743_v25 = vmul.f32 %v1159_v59, %v1663_v16  ;;  %1168 = vrsqrt.f32 %v607_v58 }
  0xf9   : > { %872 = vst [vmem:[%s2047_s17 + $0xf0] sm:$0xff] %v744_v34  ;;  %873 = vst [vmem:[%s2047_s17 + $0xf8] sm:$0xff] %v745_v60  ;;  %1170 = vrsqrt.f32 %v606_v61  ;;  %v465_v12 = vpop.xlane.xlu1 %464  ;;  %v2495_v60 = vld [vmem:[#allocation20_spill] sm:$0xff] }
  0xfa   : > { %v1161_v13 = vpop.eup %1160  ;;  %870 = vst [vmem:[%s2047_s17 + $0xe0] sm:$0xff] %v742_v8  ;;  %871 = vst [vmem:[%s2047_s17 + $0xe8] sm:$0xff] %v743_v25  ;;  %v609_v10 = vmax.f32 %v465_v12, 1e-24  ;;  %v462_v54 = vpop.xlane.xlu0 %461  ;;  %v2496_v8 = vld [vmem:[#allocation21_spill] sm:$0xff] }
  0xfb   : > { %v1163_v11 = vpop.eup %1162  ;;  %v748_v57 = vmul.f32 %v1161_v13, %v1674_v26  ;;  %v749_v15 = vmul.f32 %v1161_v13, %v1677_v27  ;;  %v608_v16 = vmax.f32 %v462_v54, 1e-24 }
  0xfc   : > { %v746_v9 = vmul.f32 %v1163_v11, %v1680_v32  ;;  %v747_v24 = vmul.f32 %v1163_v11, %v1683_v33  ;;  %1172 = vrsqrt.f32 %v609_v10 }
  0xfd   : > { %876 = vst [vmem:[%s2047_s17 + $0x110] sm:$0xff] %v748_v57  ;;  %877 = vst [vmem:[%s2047_s17 + $0x118] sm:$0xff] %v749_v15  ;;  %1174 = vrsqrt.f32 %v608_v16  ;;  %v471_v14 = vpop.xlane.xlu1 %470  ;;  %v2497_v57 = vld [vmem:[#allocation22_spill] sm:$0xff]  ;;  %v2498_v16 = vld [vmem:[#allocation23_spill] sm:$0xff] }
  0xfe   : > { %v1165_v17 = vpop.eup %1164  ;;  %874 = vst [vmem:[%s2047_s17 + $0x100] sm:$0xff] %v746_v9  ;;  %875 = vst [vmem:[%s2047_s17 + $0x108] sm:$0xff] %v747_v24  ;;  %v611_v26 = vmax.f32 %v471_v14, 1e-24  ;;  %v468_v18 = vpop.xlane.xlu0 %467  ;;  %v2499_v14 = vld [vmem:[#allocation24_spill] sm:$0xff] }
  0xff   : > { %v1167_v27 = vpop.eup %1166  ;;  %v752_v62 = vmul.f32 %v1165_v17, %v1694_v44  ;;  %v753_v32 = vmul.f32 %v1165_v17, %v1697_v45  ;;  %v610_v33 = vmax.f32 %v468_v18, 1e-24 }
 0x100   : > { %v750_v20 = vmul.f32 %v1167_v27, %v2483_v19  ;;  %v751_v47 = vmul.f32 %v1167_v27, %v2484_v46  ;;  %1176 = vrsqrt.f32 %v611_v26  ;;  %v2500_v26 = vld [vmem:[#allocation25_spill] sm:$0xff] }
 0x101   : > { %880 = vst [vmem:[%s2047_s17 + $0x130] sm:$0xff] %v752_v62  ;;  %881 = vst [vmem:[%s2047_s17 + $0x138] sm:$0xff] %v753_v32  ;;  %1178 = vrsqrt.f32 %v610_v33  ;;  %v477_v43 = vpop.xlane.xlu1 %476 }
 0x102   : > { %v1169_v55 = vpop.eup %1168  ;;  %878 = vst [vmem:[%s2047_s17 + $0x120] sm:$0xff] %v750_v20  ;;  %879 = vst [vmem:[%s2047_s17 + $0x128] sm:$0xff] %v751_v47  ;;  %v613_v44 = vmax.f32 %v477_v43, 1e-24  ;;  %v474_v28 = vpop.xlane.xlu0 %473  ;;  %v2501_v20 = vld [vmem:[#allocation26_spill] sm:$0xff]  ;;  %v2502_v47 = vld [vmem:[#allocation27_spill] sm:$0xff] }
 0x103   : > { %v1171_v45 = vpop.eup %1170  ;;  %v756_v29 = vmul.f32 %v1169_v55, %v2485_v56  ;;  %v757_v30 = vmul.f32 %v1169_v55, %v2486_v63  ;;  %v612_v31 = vmax.f32 %v474_v28, 1e-24 }
 0x104   : > { %v754_v3 = vmul.f32 %v1171_v45, %v2487_v6  ;;  %v755_v21 = vmul.f32 %v1171_v45, %v2488_v4  ;;  %1180 = vrsqrt.f32 %v613_v44  ;;  %v2503_v44 = vld [vmem:[#allocation28_spill] sm:$0xff]  ;;  %v2504_v45 = vld [vmem:[#allocation29_spill] sm:$0xff] }
 0x105   : > { %884 = vst [vmem:[%s2047_s17 + $0x150] sm:$0xff] %v756_v29  ;;  %885 = vst [vmem:[%s2047_s17 + $0x158] sm:$0xff] %v757_v30  ;;  %1182 = vrsqrt.f32 %v612_v31  ;;  %v483_v38 = vpop.xlane.xlu1 %482 }
 0x106   : > { %v1173_v0 = vpop.eup %1172  ;;  %882 = vst [vmem:[%s2047_s17 + $0x140] sm:$0xff] %v754_v3  ;;  %883 = vst [vmem:[%s2047_s17 + $0x148] sm:$0xff] %v755_v21  ;;  %v615_v39 = vmax.f32 %v483_v38, 1e-24  ;;  %v480_v1 = vpop.xlane.xlu0 %479  ;;  %v2505_v3 = vld [vmem:[#allocation30_spill] sm:$0xff]  ;;  %v2506_v21 = vld [vmem:[#allocation31_spill] sm:$0xff] }
 0x107   : > { %v1175_v40 = vpop.eup %1174  ;;  %v760_v2 = vmul.f32 %v1173_v0, %v2489_v41  ;;  %v761_v37 = vmul.f32 %v1173_v0, %v2490_v5  ;;  %v614_v42 = vmax.f32 %v480_v1, 1e-24 }
 0x108   : > { %v758_v22 = vmul.f32 %v1175_v40, %v2491_v48  ;;  %v759_v35 = vmul.f32 %v1175_v40, %v2492_v49  ;;  %1184 = vrsqrt.f32 %v615_v39  ;;  %v2507_v39 = vld [vmem:[#allocation32_spill] sm:$0xff]  ;;  %v2508_v40 = vld [vmem:[#allocation33_spill] sm:$0xff] }
 0x109   : > { %888 = vst [vmem:[%s2047_s17 + $0x170] sm:$0xff] %v760_v2  ;;  %889 = vst [vmem:[%s2047_s17 + $0x178] sm:$0xff] %v761_v37  ;;  %1186 = vrsqrt.f32 %v614_v42  ;;  %v489_v50 = vpop.xlane.xlu1 %488 }
 0x10a   : > { %v1177_v51 = vpop.eup %1176  ;;  %886 = vst [vmem:[%s2047_s17 + $0x160] sm:$0xff] %v758_v22  ;;  %887 = vst [vmem:[%s2047_s17 + $0x168] sm:$0xff] %v759_v35  ;;  %v617_v23 = vmax.f32 %v489_v50, 1e-24  ;;  %v486_v36 = vpop.xlane.xlu0 %485  ;;  %v2509_v22 = vld [vmem:[#allocation34_spill] sm:$0xff]  ;;  %v2510_v35 = vld [vmem:[#allocation35_spill] sm:$0xff] }
 0x10b   : > { %v1179_v52 = vpop.eup %1178  ;;  %v764_v58 = vmul.f32 %v1177_v51, %v2493_v53  ;;  %v765_v59 = vmul.f32 %v1177_v51, %v2494_v7  ;;  %v616_v34 = vmax.f32 %v486_v36, 1e-24 }
 0x10c   : > { %v762_v61 = vmul.f32 %v1179_v52, %v2495_v60  ;;  %v763_v25 = vmul.f32 %v1179_v52, %v2496_v8  ;;  %1188 = vrsqrt.f32 %v617_v23  ;;  %v2511_v23 = vld [vmem:[#allocation36_spill] sm:$0xff]  ;;  %v2512_v52 = vld [vmem:[#allocation37_spill] sm:$0xff] }
 0x10d   : > { %892 = vst [vmem:[%s2047_s17 + $0x190] sm:$0xff] %v764_v58  ;;  %893 = vst [vmem:[%s2047_s17 + $0x198] sm:$0xff] %v765_v59  ;;  %1190 = vrsqrt.f32 %v616_v34  ;;  %v495_v12 = vpop.xlane.xlu1 %494 }
 0x10e   : > { %v1181_v13 = vpop.eup %1180  ;;  %890 = vst [vmem:[%s2047_s17 + $0x180] sm:$0xff] %v762_v61  ;;  %891 = vst [vmem:[%s2047_s17 + $0x188] sm:$0xff] %v763_v25  ;;  %v619_v10 = vmax.f32 %v495_v12, 1e-24  ;;  %v492_v54 = vpop.xlane.xlu0 %491  ;;  %v2513_v61 = vld [vmem:[#allocation38_spill] sm:$0xff]  ;;  %v2514_v25 = vld [vmem:[#allocation39_spill] sm:$0xff] }
 0x10f   : > { %v1183_v11 = vpop.eup %1182  ;;  %v768_v15 = vmul.f32 %v1181_v13, %v2497_v57  ;;  %v769_v9 = vmul.f32 %v1181_v13, %v2498_v16  ;;  %v618_v24 = vmax.f32 %v492_v54, 1e-24 }
 0x110   : > { %v766_v17 = vmul.f32 %v1183_v11, %v2499_v14  ;;  %v767_v18 = vmul.f32 %v1183_v11, %v2500_v26  ;;  %1192 = vrsqrt.f32 %v619_v10  ;;  %v2515_v10 = vld [vmem:[#allocation40_spill] sm:$0xff]  ;;  %v2516_v11 = vld [vmem:[#allocation41_spill] sm:$0xff] }
 0x111   : > { %896 = vst [vmem:[%s2047_s17 + $0x1b0] sm:$0xff] %v768_v15  ;;  %897 = vst [vmem:[%s2047_s17 + $0x1b8] sm:$0xff] %v769_v9  ;;  %1194 = vrsqrt.f32 %v618_v24  ;;  %v501_v27 = vpop.xlane.xlu1 %500 }
 0x112   : > { %v1185_v62 = vpop.eup %1184  ;;  %894 = vst [vmem:[%s2047_s17 + $0x1a0] sm:$0xff] %v766_v17  ;;  %895 = vst [vmem:[%s2047_s17 + $0x1a8] sm:$0xff] %v767_v18  ;;  %v621_v32 = vmax.f32 %v501_v27, 1e-24  ;;  %v498_v33 = vpop.xlane.xlu0 %497  ;;  %v2517_v17 = vld [vmem:[#allocation42_spill] sm:$0xff]  ;;  %v2518_v18 = vld [vmem:[#allocation43_spill] sm:$0xff] }
 0x113   : > { %v1187_v19 = vpop.eup %1186  ;;  %v772_v46 = vmul.f32 %v1185_v62, %v2501_v20  ;;  %v773_v43 = vmul.f32 %v1185_v62, %v2502_v47  ;;  %v620_v55 = vmax.f32 %v498_v33, 1e-24 }
 0x114   : > { %v770_v28 = vmul.f32 %v1187_v19, %v2503_v44  ;;  %v771_v56 = vmul.f32 %v1187_v19, %v2504_v45  ;;  %1196 = vrsqrt.f32 %v621_v32  ;;  %v2519_v32 = vld [vmem:[#allocation44_spill] sm:$0xff]  ;;  %v2520_v19 = vld [vmem:[#allocation45_spill] sm:$0xff] }
 0x115   : > { %900 = vst [vmem:[%s2047_s17 + $0x1d0] sm:$0xff] %v772_v46  ;;  %901 = vst [vmem:[%s2047_s17 + $0x1d8] sm:$0xff] %v773_v43  ;;  %1198 = vrsqrt.f32 %v620_v55  ;;  %v507_v29 = vpop.xlane.xlu1 %506 }
 0x116   : > { %v1189_v63 = vpop.eup %1188  ;;  %898 = vst [vmem:[%s2047_s17 + $0x1c0] sm:$0xff] %v770_v28  ;;  %899 = vst [vmem:[%s2047_s17 + $0x1c8] sm:$0xff] %v771_v56  ;;  %v623_v30 = vmax.f32 %v507_v29, 1e-24  ;;  %v504_v31 = vpop.xlane.xlu0 %503  ;;  %v2521_v28 = vld [vmem:[#allocation46_spill] sm:$0xff]  ;;  %v2522_v56 = vld [vmem:[#allocation47_spill] sm:$0xff] }
 0x117   : > { %v1191_v6 = vpop.eup %1190  ;;  %v776_v4 = vmul.f32 %v1189_v63, %v2505_v3  ;;  %v777_v38 = vmul.f32 %v1189_v63, %v2506_v21  ;;  %v622_v0 = vmax.f32 %v504_v31, 1e-24 }
 0x118   : > { %v774_v1 = vmul.f32 %v1191_v6, %v2507_v39  ;;  %v775_v41 = vmul.f32 %v1191_v6, %v2508_v40  ;;  %1200 = vrsqrt.f32 %v623_v30  ;;  %v2523_v30 = vld [vmem:[#allocation48_spill] sm:$0xff]  ;;  %v2524_v6 = vld [vmem:[#allocation49_spill] sm:$0xff] }
 0x119   : > { %904 = vst [vmem:[%s2047_s17 + $0x1f0] sm:$0xff] %v776_v4  ;;  %905 = vst [vmem:[%s2047_s17 + $0x1f8] sm:$0xff] %v777_v38  ;;  %1202 = vrsqrt.f32 %v622_v0  ;;  %v513_v2 = vpop.xlane.xlu1 %512 }
 0x11a   : > { %v1193_v5 = vpop.eup %1192  ;;  %902 = vst [vmem:[%s2047_s17 + $0x1e0] sm:$0xff] %v774_v1  ;;  %903 = vst [vmem:[%s2047_s17 + $0x1e8] sm:$0xff] %v775_v41  ;;  %v625_v37 = vmax.f32 %v513_v2, 1e-24  ;;  %v510_v42 = vpop.xlane.xlu0 %509  ;;  %v2525_v1 = vld [vmem:[#allocation50_spill] sm:$0xff]  ;;  %v2526_v41 = vld [vmem:[#allocation51_spill] sm:$0xff] }
 0x11b   : > { %v1195_v48 = vpop.eup %1194  ;;  %v780_v49 = vmul.f32 %v1193_v5, %v2509_v22  ;;  %v781_v50 = vmul.f32 %v1193_v5, %v2510_v35  ;;  %v624_v51 = vmax.f32 %v510_v42, 1e-24 }
 0x11c   : > { %v778_v36 = vmul.f32 %v1195_v48, %v2511_v23  ;;  %v779_v53 = vmul.f32 %v1195_v48, %v2512_v52  ;;  %1204 = vrsqrt.f32 %v625_v37  ;;  %v2527_v37 = vld [vmem:[#allocation52_spill] sm:$0xff]  ;;  %v2528_v48 = vld [vmem:[#allocation53_spill] sm:$0xff] }
 0x11d   : > { %908 = vst [vmem:[%s2047_s17 + $0x210] sm:$0xff] %v780_v49  ;;  %909 = vst [vmem:[%s2047_s17 + $0x218] sm:$0xff] %v781_v50  ;;  %1206 = vrsqrt.f32 %v624_v51  ;;  %v519_v58 = vpop.xlane.xlu1 %518 }
 0x11e   : > { %v1197_v7 = vpop.eup %1196  ;;  %906 = vst [vmem:[%s2047_s17 + $0x200] sm:$0xff] %v778_v36  ;;  %907 = vst [vmem:[%s2047_s17 + $0x208] sm:$0xff] %v779_v53  ;;  %v627_v59 = vmax.f32 %v519_v58, 1e-24  ;;  %v516_v34 = vpop.xlane.xlu0 %515  ;;  %v2529_v36 = vld [vmem:[#allocation54_spill] sm:$0xff]  ;;  %v2530_v53 = vld [vmem:[#allocation55_spill] sm:$0xff] }
 0x11f   : > { %v1199_v60 = vpop.eup %1198  ;;  %v784_v8 = vmul.f32 %v1197_v7, %v2513_v61  ;;  %v785_v12 = vmul.f32 %v1197_v7, %v2514_v25  ;;  %v626_v13 = vmax.f32 %v516_v34, 1e-24 }
 0x120   : > { %v782_v54 = vmul.f32 %v1199_v60, %v2515_v10  ;;  %v783_v57 = vmul.f32 %v1199_v60, %v2516_v11  ;;  %1208 = vrsqrt.f32 %v627_v59  ;;  %v2531_v59 = vld [vmem:[#allocation56_spill] sm:$0xff]  ;;  %v2532_v60 = vld [vmem:[#allocation57_spill] sm:$0xff] }
 0x121   : > { %912 = vst [vmem:[%s2047_s17 + $0x230] sm:$0xff] %v784_v8  ;;  %913 = vst [vmem:[%s2047_s17 + $0x238] sm:$0xff] %v785_v12  ;;  %1210 = vrsqrt.f32 %v626_v13  ;;  %v525_v15 = vpop.xlane.xlu1 %524 }
 0x122   : > { %v1201_v16 = vpop.eup %1200  ;;  %910 = vst [vmem:[%s2047_s17 + $0x220] sm:$0xff] %v782_v54  ;;  %911 = vst [vmem:[%s2047_s17 + $0x228] sm:$0xff] %v783_v57  ;;  %v629_v9 = vmax.f32 %v525_v15, 1e-24  ;;  %v522_v24 = vpop.xlane.xlu0 %521  ;;  %v2533_v54 = vld [vmem:[#allocation58_spill] sm:$0xff]  ;;  %v2534_v57 = vld [vmem:[#allocation59_spill] sm:$0xff] }
 0x123   : > { %v1203_v14 = vpop.eup %1202  ;;  %v788_v26 = vmul.f32 %v1201_v16, %v2517_v17  ;;  %v789_v27 = vmul.f32 %v1201_v16, %v2518_v18  ;;  %v628_v62 = vmax.f32 %v522_v24, 1e-24 }
 0x124   : > { %v786_v33 = vmul.f32 %v1203_v14, %v2519_v32  ;;  %v787_v20 = vmul.f32 %v1203_v14, %v2520_v19  ;;  %1212 = vrsqrt.f32 %v629_v9  ;;  %v2535_v9 = vld [vmem:[#allocation60_spill] sm:$0xff]  ;;  %v2536_v14 = vld [vmem:[#allocation61_spill] sm:$0xff] }
 0x125   : > { %916 = vst [vmem:[%s2047_s17 + $0x250] sm:$0xff] %v788_v26  ;;  %917 = vst [vmem:[%s2047_s17 + $0x258] sm:$0xff] %v789_v27  ;;  %1214 = vrsqrt.f32 %v628_v62  ;;  %v531_v46 = vpop.xlane.xlu1 %530 }
 0x126   : > { %v1205_v47 = vpop.eup %1204  ;;  %914 = vst [vmem:[%s2047_s17 + $0x240] sm:$0xff] %v786_v33  ;;  %915 = vst [vmem:[%s2047_s17 + $0x248] sm:$0xff] %v787_v20  ;;  %v631_v43 = vmax.f32 %v531_v46, 1e-24  ;;  %v528_v55 = vpop.xlane.xlu0 %527  ;;  %v2537_v33 = vld [vmem:[#allocation62_spill] sm:$0xff]  ;;  %v2538_v20 = vld [vmem:[#allocation63_spill] sm:$0xff] }
 0x127   : > { %v1207_v44 = vpop.eup %1206  ;;  %v792_v45 = vmul.f32 %v1205_v47, %v2521_v28  ;;  %v793_v29 = vmul.f32 %v1205_v47, %v2522_v56  ;;  %v630_v63 = vmax.f32 %v528_v55, 1e-24 }
 0x128   : > { %v790_v31 = vmul.f32 %v1207_v44, %v2523_v30  ;;  %v791_v3 = vmul.f32 %v1207_v44, %v2524_v6  ;;  %1216 = vrsqrt.f32 %v631_v43  ;;  %v2539_v43 = vld [vmem:[#allocation64_spill] sm:$0xff]  ;;  %v2540_v44 = vld [vmem:[#allocation65_spill] sm:$0xff] }
 0x129   : > { %920 = vst [vmem:[%s2047_s17 + $0x270] sm:$0xff] %v792_v45  ;;  %921 = vst [vmem:[%s2047_s17 + $0x278] sm:$0xff] %v793_v29  ;;  %1218 = vrsqrt.f32 %v630_v63  ;;  %v537_v4 = vpop.xlane.xlu1 %536 }
 0x12a   : > { %v1209_v21 = vpop.eup %1208  ;;  %918 = vst [vmem:[%s2047_s17 + $0x260] sm:$0xff] %v790_v31  ;;  %919 = vst [vmem:[%s2047_s17 + $0x268] sm:$0xff] %v791_v3  ;;  %v633_v38 = vmax.f32 %v537_v4, 1e-24  ;;  %v534_v0 = vpop.xlane.xlu0 %533  ;;  %v2541_v31 = vld [vmem:[#allocation66_spill] sm:$0xff]  ;;  %v2542_v3 = vld [vmem:[#allocation67_spill] sm:$0xff] }
 0x12b   : > { %v1211_v39 = vpop.eup %1210  ;;  %v796_v40 = vmul.f32 %v1209_v21, %v2525_v1  ;;  %v797_v2 = vmul.f32 %v1209_v21, %v2526_v41  ;;  %v632_v5 = vmax.f32 %v534_v0, 1e-24 }
 0x12c   : > { %v794_v42 = vmul.f32 %v1211_v39, %v2527_v37  ;;  %v795_v22 = vmul.f32 %v1211_v39, %v2528_v48  ;;  %1220 = vrsqrt.f32 %v633_v38  ;;  %v2543_v38 = vld [vmem:[#allocation68_spill] sm:$0xff]  ;;  %v2544_v39 = vld [vmem:[#allocation69_spill] sm:$0xff] }
 0x12d   : > { %924 = vst [vmem:[%s2047_s17 + $0x290] sm:$0xff] %v796_v40  ;;  %925 = vst [vmem:[%s2047_s17 + $0x298] sm:$0xff] %v797_v2  ;;  %1222 = vrsqrt.f32 %v632_v5  ;;  %v543_v49 = vpop.xlane.xlu1 %542 }
 0x12e   : > { %v1213_v35 = vpop.eup %1212  ;;  %922 = vst [vmem:[%s2047_s17 + $0x280] sm:$0xff] %v794_v42  ;;  %923 = vst [vmem:[%s2047_s17 + $0x288] sm:$0xff] %v795_v22  ;;  %v635_v50 = vmax.f32 %v543_v49, 1e-24  ;;  %v540_v51 = vpop.xlane.xlu0 %539  ;;  %v1256_v42 = vld [vmem:[%s1507_s30 + $0x330] sm:$0xff]  ;;  %v1257_v22 = vld [vmem:[%s1507_s30 + $0x338] sm:$0xff] }
 0x12f   : > { %v1215_v23 = vpop.eup %1214  ;;  %v800_v52 = vmul.f32 %v1213_v35, %v2529_v36  ;;  %v801_v58 = vmul.f32 %v1213_v35, %v2530_v53  ;;  %v634_v7 = vmax.f32 %v540_v51, 1e-24 }
 0x130   : > { %v798_v34 = vmul.f32 %v1215_v23, %v2531_v59  ;;  %v799_v61 = vmul.f32 %v1215_v23, %v2532_v60  ;;  %1224 = vrsqrt.f32 %v635_v50  ;;  %v1258_v50 = vld [vmem:[%s1507_s30 + $0x320] sm:$0xff]  ;;  %v1259_v23 = vld [vmem:[%s1507_s30 + $0x328] sm:$0xff] }
 0x131   : > { %928 = vst [vmem:[%s2047_s17 + $0x2b0] sm:$0xff] %v800_v52  ;;  %929 = vst [vmem:[%s2047_s17 + $0x2b8] sm:$0xff] %v801_v58  ;;  %1226 = vrsqrt.f32 %v634_v7  ;;  %v549_v8 = vpop.xlane.xlu1 %548 }
 0x132   : > { %v1217_v25 = vpop.eup %1216  ;;  %926 = vst [vmem:[%s2047_s17 + $0x2a0] sm:$0xff] %v798_v34  ;;  %927 = vst [vmem:[%s2047_s17 + $0x2a8] sm:$0xff] %v799_v61  ;;  %v637_v12 = vmax.f32 %v549_v8, 1e-24  ;;  %v546_v13 = vpop.xlane.xlu0 %545  ;;  %v1260_v34 = vld [vmem:[%s1507_s30 + $0x350] sm:$0xff]  ;;  %v1261_v61 = vld [vmem:[%s1507_s30 + $0x358] sm:$0xff] }
 0x133   : > { %v1219_v10 = vpop.eup %1218  ;;  %v804_v11 = vmul.f32 %v1217_v25, %v2533_v54  ;;  %v805_v15 = vmul.f32 %v1217_v25, %v2534_v57  ;;  %v636_v16 = vmax.f32 %v546_v13, 1e-24 }
 0x134   : > { %v802_v24 = vmul.f32 %v1219_v10, %v2535_v9  ;;  %v803_v17 = vmul.f32 %v1219_v10, %v2536_v14  ;;  %1228 = vrsqrt.f32 %v637_v12  ;;  %v1262_v12 = vld [vmem:[%s1507_s30 + $0x340] sm:$0xff]  ;;  %v1263_v10 = vld [vmem:[%s1507_s30 + $0x348] sm:$0xff] }
 0x135   : > { %932 = vst [vmem:[%s2047_s17 + $0x2d0] sm:$0xff] %v804_v11  ;;  %933 = vst [vmem:[%s2047_s17 + $0x2d8] sm:$0xff] %v805_v15  ;;  %1230 = vrsqrt.f32 %v636_v16  ;;  %v555_v26 = vpop.xlane.xlu1 %554 }
 0x136   : > { %v1221_v18 = vpop.eup %1220  ;;  %930 = vst [vmem:[%s2047_s17 + $0x2c0] sm:$0xff] %v802_v24  ;;  %931 = vst [vmem:[%s2047_s17 + $0x2c8] sm:$0xff] %v803_v17  ;;  %v639_v27 = vmax.f32 %v555_v26, 1e-24  ;;  %v552_v62 = vpop.xlane.xlu0 %551  ;;  %v1264_v24 = vld [vmem:[%s1507_s30 + $0x370] sm:$0xff]  ;;  %v1265_v17 = vld [vmem:[%s1507_s30 + $0x378] sm:$0xff] }
 0x137   : > { %v1223_v32 = vpop.eup %1222  ;;  %v808_v19 = vmul.f32 %v1221_v18, %v2537_v33  ;;  %v809_v46 = vmul.f32 %v1221_v18, %v2538_v20  ;;  %v638_v47 = vmax.f32 %v552_v62, 1e-24 }
 0x138   : > { %v806_v55 = vmul.f32 %v1223_v32, %v2539_v43  ;;  %v807_v28 = vmul.f32 %v1223_v32, %v2540_v44  ;;  %1232 = vrsqrt.f32 %v639_v27  ;;  %v1266_v27 = vld [vmem:[%s1507_s30 + $0x360] sm:$0xff]  ;;  %v1267_v32 = vld [vmem:[%s1507_s30 + $0x368] sm:$0xff] }
 0x139   : > { %936 = vst [vmem:[%s2047_s17 + $0x2f0] sm:$0xff] %v808_v19  ;;  %937 = vst [vmem:[%s2047_s17 + $0x2f8] sm:$0xff] %v809_v46  ;;  %1234 = vrsqrt.f32 %v638_v47  ;;  %v561_v45 = vpop.xlane.xlu1 %560 }
 0x13a   : > { %v1225_v56 = vpop.eup %1224  ;;  %934 = vst [vmem:[%s2047_s17 + $0x2e0] sm:$0xff] %v806_v55  ;;  %935 = vst [vmem:[%s2047_s17 + $0x2e8] sm:$0xff] %v807_v28  ;;  %v641_v29 = vmax.f32 %v561_v45, 1e-24  ;;  %v558_v63 = vpop.xlane.xlu0 %557  ;;  %v1268_v55 = vld [vmem:[%s1507_s30 + $0x390] sm:$0xff]  ;;  %v1269_v28 = vld [vmem:[%s1507_s30 + $0x398] sm:$0xff] }
 0x13b   : > { %v1227_v30 = vpop.eup %1226  ;;  %v812_v6 = vmul.f32 %v1225_v56, %v2541_v31  ;;  %v813_v4 = vmul.f32 %v1225_v56, %v2542_v3  ;;  %v640_v21 = vmax.f32 %v558_v63, 1e-24 }
 0x13c   : > { %v810_v0 = vmul.f32 %v1227_v30, %v2543_v38  ;;  %v811_v1 = vmul.f32 %v1227_v30, %v2544_v39  ;;  %1236 = vrsqrt.f32 %v641_v29  ;;  %v1270_v29 = vld [vmem:[%s1507_s30 + $0x380] sm:$0xff]  ;;  %v1271_v30 = vld [vmem:[%s1507_s30 + $0x388] sm:$0xff]  ;;  %v1273_v38 = vld [vmem:[%s1507_s30 + $0x3b8] sm:$0xff] }
 0x13d   : > { %940 = vst [vmem:[%s2047_s17 + $0x310] sm:$0xff] %v812_v6  ;;  %941 = vst [vmem:[%s2047_s17 + $0x318] sm:$0xff] %v813_v4  ;;  %1238 = vrsqrt.f32 %v640_v21  ;;  %v567_v40 = vpop.xlane.xlu1 %566  ;;  %v1272_v4 = vld [vmem:[%s1507_s30 + $0x3b0] sm:$0xff]  ;;  %v1274_v39 = vld [vmem:[%s1507_s30 + $0x3a0] sm:$0xff] }
 0x13e   : > { %v1229_v41 = vpop.eup %1228  ;;  %938 = vst [vmem:[%s2047_s17 + $0x300] sm:$0xff] %v810_v0  ;;  %939 = vst [vmem:[%s2047_s17 + $0x308] sm:$0xff] %v811_v1  ;;  %v643_v2 = vmax.f32 %v567_v40, 1e-24  ;;  %v564_v5 = vpop.xlane.xlu0 %563  ;;  %v1275_v40 = vld [vmem:[%s1507_s30 + $0x3a8] sm:$0xff] }
 0x13f   : > { %v1231_v37 = vpop.eup %1230  ;;  %v816_v48 = vmul.f32 %v1256_v42, %v1229_v41  ;;  %v817_v49 = vmul.f32 %v1257_v22, %v1229_v41  ;;  %v642_v35 = vmax.f32 %v564_v5, 1e-24 }
 0x140   : > { %v814_v51 = vmul.f32 %v1258_v50, %v1231_v37  ;;  %v815_v36 = vmul.f32 %v1259_v23, %v1231_v37  ;;  %1240 = vrsqrt.f32 %v643_v2  ;;  %v1276_v37 = vld [vmem:[%s1507_s30 + $0x3d0] sm:$0xff]  ;;  %v1279_v50 = vld [vmem:[%s1507_s30 + $0x3c8] sm:$0xff] }
 0x141   : > { %944 = vst [vmem:[%s2047_s17 + $0x330] sm:$0xff] %v816_v48  ;;  %945 = vst [vmem:[%s2047_s17 + $0x338] sm:$0xff] %v817_v49  ;;  %1242 = vrsqrt.f32 %v642_v35  ;;  %v573_v52 = vpop.xlane.xlu1 %572  ;;  %v1277_v48 = vld [vmem:[%s1507_s30 + $0x3d8] sm:$0xff]  ;;  %v1278_v49 = vld [vmem:[%s1507_s30 + $0x3c0] sm:$0xff] }
 0x142   : > { %v1233_v53 = vpop.eup %1232  ;;  %942 = vst [vmem:[%s2047_s17 + $0x320] sm:$0xff] %v814_v51  ;;  %943 = vst [vmem:[%s2047_s17 + $0x328] sm:$0xff] %v815_v36  ;;  %v645_v58 = vmax.f32 %v573_v52, 1e-24  ;;  %v570_v7 = vpop.xlane.xlu0 %569  ;;  %v1280_v52 = vld [vmem:[%s1507_s30 + $0x3f0] sm:$0xff] }
 0x143   : > { %v1235_v59 = vpop.eup %1234  ;;  %v820_v60 = vmul.f32 %v1260_v34, %v1233_v53  ;;  %v821_v8 = vmul.f32 %v1261_v61, %v1233_v53  ;;  %v644_v25 = vmax.f32 %v570_v7, 1e-24 }
 0x144   : > { %v818_v13 = vmul.f32 %v1262_v12, %v1235_v59  ;;  %v819_v54 = vmul.f32 %v1263_v10, %v1235_v59  ;;  %1244 = vrsqrt.f32 %v645_v58  ;;  %v1281_v58 = vld [vmem:[%s1507_s30 + $0x3f8] sm:$0xff]  ;;  %v1282_v59 = vld [vmem:[%s1507_s30 + $0x3e0] sm:$0xff] }
 0x145   : > { %948 = vst [vmem:[%s2047_s17 + $0x350] sm:$0xff] %v820_v60  ;;  %949 = vst [vmem:[%s2047_s17 + $0x358] sm:$0xff] %v821_v8  ;;  %1246 = vrsqrt.f32 %v644_v25  ;;  %v579_v11 = vpop.xlane.xlu1 %578  ;;  %v1283_v60 = vld [vmem:[%s1507_s30 + $0x3e8] sm:$0xff] }
 0x146   : > { %v1237_v57 = vpop.eup %1236  ;;  %946 = vst [vmem:[%s2047_s17 + $0x340] sm:$0xff] %v818_v13  ;;  %947 = vst [vmem:[%s2047_s17 + $0x348] sm:$0xff] %v819_v54  ;;  %v647_v15 = vmax.f32 %v579_v11, 1e-24  ;;  %v576_v16 = vpop.xlane.xlu0 %575 }
 0x147   : > { %v1239_v9 = vpop.eup %1238  ;;  %v824_v14 = vmul.f32 %v1264_v24, %v1237_v57  ;;  %v825_v26 = vmul.f32 %v1265_v17, %v1237_v57  ;;  %v646_v18 = vmax.f32 %v576_v16, 1e-24 }
 0x148   : > { %v822_v62 = vmul.f32 %v1266_v27, %v1239_v9  ;;  %v823_v33 = vmul.f32 %v1267_v32, %v1239_v9  ;;  %1248 = vrsqrt.f32 %v647_v15 }
 0x149   : > { %952 = vst [vmem:[%s2047_s17 + $0x370] sm:$0xff] %v824_v14  ;;  %953 = vst [vmem:[%s2047_s17 + $0x378] sm:$0xff] %v825_v26  ;;  %1250 = vrsqrt.f32 %v646_v18  ;;  %v585_v19 = vpop.xlane.xlu1 %584 }
 0x14a   : > { %v1241_v20 = vpop.eup %1240  ;;  %950 = vst [vmem:[%s2047_s17 + $0x360] sm:$0xff] %v822_v62  ;;  %951 = vst [vmem:[%s2047_s17 + $0x368] sm:$0xff] %v823_v33  ;;  %v649_v46 = vmax.f32 %v585_v19, 1e-24  ;;  %v582_v47 = vpop.xlane.xlu0 %581 }
 0x14b   : > { %v1243_v43 = vpop.eup %1242  ;;  %v828_v44 = vmul.f32 %v1268_v55, %v1241_v20  ;;  %v829_v45 = vmul.f32 %v1269_v28, %v1241_v20  ;;  %v648_v56 = vmax.f32 %v582_v47, 1e-24 }
 0x14c   : > { %v826_v63 = vmul.f32 %v1270_v29, %v1243_v43  ;;  %v827_v31 = vmul.f32 %v1271_v30, %v1243_v43  ;;  %1252 = vrsqrt.f32 %v649_v46 }
 0x14d   : > { %956 = vst [vmem:[%s2047_s17 + $0x390] sm:$0xff] %v828_v44  ;;  %957 = vst [vmem:[%s2047_s17 + $0x398] sm:$0xff] %v829_v45  ;;  %1254 = vrsqrt.f32 %v648_v56 }
 0x14e   : > { %v1245_v6 = vpop.eup %1244  ;;  %954 = vst [vmem:[%s2047_s17 + $0x380] sm:$0xff] %v826_v63  ;;  %955 = vst [vmem:[%s2047_s17 + $0x388] sm:$0xff] %v827_v31 }
 0x14f   : > { %v1247_v3 = vpop.eup %1246  ;;  %v832_v21 = vmul.f32 %v1272_v4, %v1245_v6  ;;  %v833_v0 = vmul.f32 %v1273_v38, %v1245_v6 }
 0x150   : > { %v830_v1 = vmul.f32 %v1274_v39, %v1247_v3  ;;  %v831_v41 = vmul.f32 %v1275_v40, %v1247_v3 }
 0x151   : > { %960 = vst [vmem:[%s2047_s17 + $0x3b0] sm:$0xff] %v832_v21  ;;  %961 = vst [vmem:[%s2047_s17 + $0x3b8] sm:$0xff] %v833_v0 }
 0x152   : > { %v1249_v2 = vpop.eup %1248  ;;  %958 = vst [vmem:[%s2047_s17 + $0x3a0] sm:$0xff] %v830_v1  ;;  %959 = vst [vmem:[%s2047_s17 + $0x3a8] sm:$0xff] %v831_v41 }
 0x153   : > { %v1251_v5 = vpop.eup %1250  ;;  %v836_v42 = vmul.f32 %v1276_v37, %v1249_v2  ;;  %v837_v22 = vmul.f32 %v1277_v48, %v1249_v2 }
 0x154   : > { %v834_v35 = vmul.f32 %v1278_v49, %v1251_v5  ;;  %v835_v51 = vmul.f32 %v1279_v50, %v1251_v5 }
 0x155   : > { %964 = vst [vmem:[%s2047_s17 + $0x3d0] sm:$0xff] %v836_v42  ;;  %965 = vst [vmem:[%s2047_s17 + $0x3d8] sm:$0xff] %v837_v22 }
 0x156   : > { %v1253_v23 = vpop.eup %1252  ;;  %962 = vst [vmem:[%s2047_s17 + $0x3c0] sm:$0xff] %v834_v35  ;;  %963 = vst [vmem:[%s2047_s17 + $0x3c8] sm:$0xff] %v835_v51 }
 0x157   : > { %v1255_v36 = vpop.eup %1254  ;;  %v840_v53 = vmul.f32 %v1280_v52, %v1253_v23  ;;  %v841_v7 = vmul.f32 %v1281_v58, %v1253_v23 }
 0x158   : > { %v838_v34 = vmul.f32 %v1282_v59, %v1255_v36  ;;  %v839_v61 = vmul.f32 %v1283_v60, %v1255_v36 }
 0x159   : > { %968 = vst [vmem:[%s2047_s17 + $0x3f0] sm:$0xff] %v840_v53  ;;  %969 = vst [vmem:[%s2047_s17 + $0x3f8] sm:$0xff] %v841_v7 }
 0x15a   : > { %966 = vst [vmem:[%s2047_s17 + $0x3e0] sm:$0xff] %v838_v34  ;;  %967 = vst [vmem:[%s2047_s17 + $0x3e8] sm:$0xff] %v839_v61 }
 0x15b   : > { %1327 = shalt.err (!%p1324_p1)
}
 0x15c   : > { %s1328_s13 = scalar_lea.hbm %s2300_s29, 16384  ;;  %s1332_s20 = scalar_lea.hbm %s2352_s1, 65536 }
 0x15d   : > { %p1329_p3 = scmp.ne.s32.totalorder %s2300_s29, %s1328_s13  ;;  %p1333_p0 = scmp.lt.u32.totalorder %s2300_s29, %s2352_s1 }
 0x15e   : > { %p1334_p2 = scmp.lt.u32.totalorder %s1332_s20, %s1328_s13  ;;  %p1336_p6 = scmp.lt.u32.totalorder %s1328_s13, %s2300_s29 }
 0x15f   : > { %p1330_p4 = pnand %p1329_p3, %p2545_p10 }
 0x160   : > { %p1335_p7 = por %p1334_p2, %p1333_p0 }
 0x161   : > { %p1331_p5 = pneg %p1330_p4 }
 0x162   : > { %p1337_p11 = por %p1336_p6, %p1335_p7 }
 0x164   : > { %p1338_p12 = pnand %p1337_p11, %p1331_p5 }
 0x166   : > { %1341 = shalt.err (!%p1338_p12)
}
 0x167   : > { %s1386_s24 = smov 256   ;;  %s1387_s26 = smov 16  }
 0x168   : > { %1080 = dma.vmem_to_hbm [thread:$0]  (%p2545_p10), %s2302_s27, 16384, %s2300_s29, %s971_s2, %s1386_s24, %s1386_s24, %s1387_s26  }
 0x169 PF: > { %p1091_p8 = scmp.ge.s32.totalorder %s1380_s9, 2  ;;  %s1000_s30 = sand.u32 1, %s1368_s6  }
 0x16a   : > { %p2546_p9 = scmp.ne.s32.totalorder %s2419_s19, 0  ;;  %s1001_s17 = scalar_lea.sflag [#allocation4], %s1000_s30 }
 0x16c   : > { %p1087_p13 = pnand %p1091_p8, %p2546_p9 }
 0x16e   : > { %1363 = dma.done.wait (!%p1087_p13), %s1001_s17, 16384  }
 0x16f   : > { %1365 = vsyncadd (!%p1087_p13), %s1001_s17, 4294950912  ;;  %p14_p1 = scmp.ge.s32.totalorder %s1423_s12, 6   ;;  %s2547_s6 = smov %s1372_s7 }
 0x170   : > { %s2548_s7 = smov %s1376_s8  ;;  %s2549_s8 = smov %s1435_s15 }
 0x171   : > { %s2550_s9 = smov %s1423_s12  ;;  %16 = sbr.rel (!%p14_p1) target bundleno = 5 (0x5), region = 69 }
 0x178   :  { %1006 = vsyncpa [#allocation3], 1 }
 0x179   :  { %1008 = vsyncpa [#allocation3 + $0x1], 1 }
 0x17a   :  { %1009 = vsyncpa [#allocation4], 1 }
 0x17b   :  { %1011 = vsyncpa [#allocation4 + $0x1], 1 }

</bundles_post_ra>
